<compile_context>
chip_gen: v7x
topology: tpu7x:2x2x1
jax: 0.10.0
libtpu: 0.0.40
codegen_flags: <defaults>
</compile_context>

<pallas_src>
import numpy as np

import jax
import jax.numpy as jnp
from jax import lax
from jax.experimental import pallas as pl
from jax.experimental.pallas import tpu as pltpu

EPS = 1e-5
LANES = 128
KSIZE = 5          # conv kernel size (fixed by the module)
H_IN = 32          # input spatial size (implied by fc8 in_features = wf*16*5*5)
CONV1_S = 28       # conv1 output spatial
P1 = 14            # after pool3
CONV2_S = 10       # conv4 output spatial
P2 = 5             # after pool6


def _vmem():
    # every operand here is tiny -> whole-array VMEM residency, no tiling needed
    return pl.BlockSpec(memory_space=pltpu.MemorySpace.VMEM)


# ---------------------------------------------------------------------------
# The single fused kernel
# ---------------------------------------------------------------------------
def _lenet5_bn_fused_kernel(slabs_ref, w1b_ref, gred1_ref, gbc1_ref,
                            w2b_ref, gred2_ref, gbc2_ref,
                            w8s_ref, b8_ref, w10_ref, b10_ref,
                            w12_ref, b12_ref, out_ref):
    """Fused LeNet5_BN forward (training-mode BatchNorm batch statistics).

    slabs_ref: (5*28N, 32*Cin) bf16 — conv1 row-tap slabs; within each tap rows are ordered
               (q, p, m, n) where conv row i = 2a+q, pooled row a = 2m+p (parity-major so the
               conv4 row slabs below become contiguous slices).
    w1b_ref / w2b_ref: banded conv weights (see prepare_params); output columns ordered
               (pool-phase, pooled-width, channel) so width pooling = max of column halves.
    gred*/gbc*: 0/1 per-channel reduce / broadcast matrices for the packed column layouts.
    w8s_ref:   fc8 weight reordered into 5 row blocks (one per pooled row a2), absorbing the
               PyTorch (C, H, W) flatten order.
    out_ref:   (N, 128) logits, lane-padded for a dense store (sliced in glue).
    """
    n = out_ref.shape[0]                         # batch
    kin = w1b_ref.shape[0] // KSIZE              # 32*Cin
    rows1 = slabs_ref.shape[0] // KSIZE          # 28*N conv1 output rows
    k2 = w2b_ref.shape[0] // KSIZE               # 14*C1
    kb = w8s_ref.shape[0] // P2                  # 5*C2

    slabs = slabs_ref[...]
    w1b = w1b_ref[...]

    # ---- conv1: 5 banded row-tap matmuls -> (28N, 28*C1), rows (q,p,m,n), cols (jq,b,c1)
    conv1 = jnp.dot(slabs[0:rows1], w1b[0:kin], preferred_element_type=jnp.float32)
    for ki in range(1, KSIZE):
        conv1 = conv1 + jnp.dot(slabs[ki * rows1:(ki + 1) * rows1],
                                w1b[ki * kin:(ki + 1) * kin],
                                preferred_element_type=jnp.float32)

    # ---- BatchNorm1: batch stats, gamma=1 / beta=0, two-pass f32 variance
    gred1 = gred1_ref[...]
    gbc1 = gbc1_ref[...]
    inv1 = 1.0 / (conv1.shape[0] * CONV1_S)      # = 1 / (N*28*28) positions per channel
    mean1 = jnp.dot(conv1.sum(axis=0, keepdims=True), gred1,
                    preferred_element_type=jnp.float32) * inv1           # (1, C1)
    d1 = conv1 - jnp.dot(mean1, gbc1, preferred_element_type=jnp.float32)
    var1 = jnp.dot((d1 * d1).sum(axis=0, keepdims=True), gred1,
                   preferred_element_type=jnp.float32) * inv1            # (1, C1)
    scale1 = lax.rsqrt(var1 + EPS)
    shift1 = -mean1 * scale1

    # ---- pool3: 2x2 max == max over row halves (q) and column halves (jq); BN affine and
    #      relu2 applied after the max (exact: scale > 0, relu/max monotone). Conv bias is
    #      dropped: training-mode BN with beta=0 cancels it (and it is zero-initialized).
    hr1 = conv1.shape[0] // 2                    # 14*N
    hc1 = conv1.shape[1] // 2                    # 14*C1
    pool1 = jnp.maximum(jnp.maximum(conv1[:hr1, :hc1], conv1[:hr1, hc1:]),
                        jnp.maximum(conv1[hr1:, :hc1], conv1[hr1:, hc1:]))
    s1p = jnp.dot(scale1, gbc1[:, :hc1], preferred_element_type=jnp.float32)
    t1p = jnp.dot(shift1, gbc1[:, :hc1], preferred_element_type=jnp.float32)
    act1 = jnp.maximum(pool1 * s1p + t1p, 0.0).astype(jnp.bfloat16)
    # act1: (14N, 14*C1) bf16, rows (p, m, n) [pooled row a = 2m+p], cols (b, c1)

    # ---- conv4: banded matmuls; the two output row-phases q2 are separate accumulators.
    #      Parity-major act1 rows make every (q2, ki2) slab a contiguous row slice.
    w2b = w2b_ref[...]
    m2 = P2 * n                                  # 5*N rows per phase block
    conv2 = []
    for q2 in range(2):
        acc = None
        for ki2 in range(KSIZE):
            s = q2 + ki2                         # pooled input row a = 2*a2 + s
            off = (s % 2) * (P1 // 2) * n + (s // 2) * n
            part = jnp.dot(act1[off:off + m2], w2b[ki2 * k2:(ki2 + 1) * k2],
                           preferred_element_type=jnp.float32)
            acc = part if acc is None else acc + part
        conv2.append(acc)                        # (5N, 10*C2), rows (a2, n), cols (jq2, b2, c2)

    # ---- BatchNorm2 (two-pass, f32)
    gred2 = gred2_ref[...]
    gbc2 = gbc2_ref[...]
    inv2 = 1.0 / (2 * m2 * CONV2_S)              # = 1 / (N*10*10) positions per channel
    mean2 = jnp.dot(conv2[0].sum(axis=0, keepdims=True)
                    + conv2[1].sum(axis=0, keepdims=True), gred2,
                    preferred_element_type=jnp.float32) * inv2
    mean2_b = jnp.dot(mean2, gbc2, preferred_element_type=jnp.float32)
    d20 = conv2[0] - mean2_b
    d21 = conv2[1] - mean2_b
    var2 = jnp.dot((d20 * d20).sum(axis=0, keepdims=True)
                   + (d21 * d21).sum(axis=0, keepdims=True), gred2,
                   preferred_element_type=jnp.float32) * inv2
    scale2 = lax.rsqrt(var2 + EPS)
    shift2 = -mean2 * scale2

    # ---- pool6 (+ BN affine + relu5): max over the two q2 blocks and the two column halves
    hc2 = conv2[0].shape[1] // 2                 # 5*C2
    pool2 = jnp.maximum(jnp.maximum(conv2[0][:, :hc2], conv2[0][:, hc2:]),
                        jnp.maximum(conv2[1][:, :hc2], conv2[1][:, hc2:]))
    s2p = jnp.dot(scale2, gbc2[:, :hc2], preferred_element_type=jnp.float32)
    t2p = jnp.dot(shift2, gbc2[:, :hc2], preferred_element_type=jnp.float32)
    act2 = jnp.maximum(pool2 * s2p + t2p, 0.0).astype(jnp.bfloat16)
    # act2: (5N, 5*C2) bf16, rows (a2, n), cols (b2, c2)

    # ---- fl7 + fc8 + relu9: 5 matmuls (K = 5*C2) over the a2 row blocks
    w8s = w8s_ref[...]
    h = jnp.dot(act2[0:n], w8s[0:kb], preferred_element_type=jnp.float32)
    for a2 in range(1, P2):
        h = h + jnp.dot(act2[a2 * n:(a2 + 1) * n], w8s[a2 * kb:(a2 + 1) * kb],
                        preferred_element_type=jnp.float32)
    h = jnp.maximum(h + b8_ref[...], 0.0).astype(jnp.bfloat16)

    # ---- fc10 + relu11 + fc12 (output lane-padded to 128 for a dense store)
    h = jnp.maximum(jnp.dot(h, w10_ref[...], preferred_element_type=jnp.float32)
                    + b10_ref[...], 0.0).astype(jnp.bfloat16)
    out_ref[...] = (jnp.dot(h, w12_ref[...], preferred_element_type=jnp.float32)
                    + b12_ref[...])


# ---------------------------------------------------------------------------
# Glue: one row-gather + one-time weight re-layout
# ---------------------------------------------------------------------------
def _stage1_slab_indices(n):
    """Flat row indices building the 5 conv1 row-tap slabs (ordered ki, q, p, m, n)."""
    ki = np.arange(KSIZE).reshape(KSIZE, 1, 1, 1, 1)
    q = np.arange(2).reshape(1, 2, 1, 1, 1)          # pool-row phase: conv row i = 2a + q
    p = np.arange(2).reshape(1, 1, 2, 1, 1)          # pooled-row parity: a = 2m + p
    m = np.arange(P1 // 2).reshape(1, 1, 1, P1 // 2, 1)
    nn = np.arange(n).reshape(1, 1, 1, 1, n)
    idx = nn * H_IN + 4 * m + 2 * p + q + ki         # image row (i + ki) of sample nn
    return jnp.asarray(idx.reshape(-1), dtype=jnp.int32)


def prepare_params(params):
    """One-time (outside jit) re-layout of the PyTorch-style parameters."""
    c1w = np.asarray(params["conv1_w"], np.float32)   # (C1, Cin, 5, 5)
    c4w = np.asarray(params["conv4_w"], np.float32)   # (C2, C1, 5, 5)
    f8w = np.asarray(params["fc8_w"], np.float32)     # (F8, C2*25)
    f10w = np.asarray(params["fc10_w"], np.float32)   # (F10, F8)
    f12w = np.asarray(params["fc12_w"], np.float32)   # (ncls, F10)
    C1, cin = c1w.shape[0], c1w.shape[1]
    C2 = c4w.shape[0]
    F8 = f8w.shape[0]

    # conv1 banded weights: w1b[ki] (32*Cin, 2*14*C1); input col (jcol, c) -> output col
    # (jq, b, c1) with conv output width j = 2b + jq and kj = jcol - j in [0, 5).
    w1b = np.zeros((KSIZE, H_IN * cin, 2 * P1 * C1), np.float32)
    for ki in range(KSIZE):
        for jq in range(2):
            for b in range(P1):
                j = 2 * b + jq
                for kj in range(KSIZE):
                    jcol = j + kj
                    w1b[ki, jcol * cin:(jcol + 1) * cin,
                        jq * P1 * C1 + b * C1: jq * P1 * C1 + (b + 1) * C1] = c1w[:, :, ki, kj].T
    w1b = w1b.reshape(KSIZE * H_IN * cin, 2 * P1 * C1)

    # conv4 banded weights: w2b[ki2] (14*C1, 2*5*C2); input col (b, c1) -> (jq2, b2, c2).
    w2b = np.zeros((KSIZE, P1 * C1, 2 * P2 * C2), np.float32)
    for ki2 in range(KSIZE):
        for jq2 in range(2):
            for b2 in range(P2):
                j2 = 2 * b2 + jq2
                for kj2 in range(KSIZE):
                    b = j2 + kj2
                    w2b[ki2, b * C1:(b + 1) * C1,
                        jq2 * P2 * C2 + b2 * C2: jq2 * P2 * C2 + (b2 + 1) * C2] = c4w[:, :, ki2, kj2].T
    w2b = w2b.reshape(KSIZE * P1 * C1, 2 * P2 * C2)

    # per-channel reduce / broadcast matrices for the packed (phase, width, channel) columns
    gred1 = np.kron(np.ones((2 * P1, 1), np.float32), np.eye(C1, dtype=np.float32))
    gbc1 = np.kron(np.ones((1, 2 * P1), np.float32), np.eye(C1, dtype=np.float32))
    gred2 = np.kron(np.ones((2 * P2, 1), np.float32), np.eye(C2, dtype=np.float32))
    gbc2 = np.kron(np.ones((1, 2 * P2), np.float32), np.eye(C2, dtype=np.float32))

    # fc8 weight reordered into 5 row blocks (a2-major), rows (b2, c2) inside each block:
    # absorbs PyTorch's (C, H, W) flatten order -> no in-kernel transpose / reshape.
    w8s = f8w.reshape(F8, C2, P2, P2).transpose(2, 3, 1, 0).reshape(P2 * P2 * C2, F8)

    def _pad_lanes(a):
        cpad = ((a.shape[-1] + LANES - 1) // LANES) * LANES
        if cpad == a.shape[-1]:
            return a
        return np.pad(a, [(0, 0)] * (a.ndim - 1) + [(0, cpad - a.shape[-1])])

    bf, f32 = jnp.bfloat16, jnp.float32
    return dict(
        w1b=jnp.asarray(w1b, bf), w2b=jnp.asarray(w2b, bf),
        gred1=jnp.asarray(gred1, f32), gbc1=jnp.asarray(gbc1, f32),
        gred2=jnp.asarray(gred2, f32), gbc2=jnp.asarray(gbc2, f32),
        w8s=jnp.asarray(w8s, bf),
        b8=jnp.asarray(np.asarray(params["fc8_b"], np.float32).reshape(1, -1), f32),
        w10=jnp.asarray(f10w.T, bf),
        b10=jnp.asarray(np.asarray(params["fc10_b"], np.float32).reshape(1, -1), f32),
        w12p=jnp.asarray(_pad_lanes(f12w.T), bf),
        b12p=jnp.asarray(_pad_lanes(np.asarray(params["fc12_b"], np.float32).reshape(1, -1)), f32),
    )


def lenet5_bn_forward(prep, x_nchw, *, num_classes=10):
    """LeNet5_BN forward (training-mode BatchNorm, fresh gamma=1 / beta=0)."""
    N, cin, H, W = x_nchw.shape
    assert H == H_IN and W == H_IN, "LeNet5_BN geometry requires 32x32 inputs"
    # NCHW -> NHWC -> row matrix: rows (n, image_row), cols (image_col, channel)
    x2 = jnp.transpose(x_nchw, (0, 2, 3, 1)).astype(jnp.bfloat16).reshape(N * H_IN, H_IN * cin)
    # the ONLY im2col-ish glue: one gather building the 5 row-tap slabs (5x data expansion)
    slabs = jnp.take(x2, _stage1_slab_indices(N), axis=0)

    out_pad = pl.pallas_call(
        _lenet5_bn_fused_kernel,
        out_shape=jax.ShapeDtypeStruct((N, LANES), jnp.float32),
        in_specs=[_vmem()] * 13,
        out_specs=_vmem(),
        compiler_params=pltpu.CompilerParams(vmem_limit_bytes=32 * 1024 * 1024),
    )(slabs, prep["w1b"], prep["gred1"], prep["gbc1"],
      prep["w2b"], prep["gred2"], prep["gbc2"],
      prep["w8s"], prep["b8"], prep["w10"], prep["b10"],
      prep["w12p"], prep["b12p"])
    return out_pad[:, :num_classes]


# ---------------------------------------------------------------------------
# Deterministic parameter init (matches LeNet5_BN._init_weight)
# ---------------------------------------------------------------------------
def init_params(key, num_classes=10, wider_factor=1, n_channels=1):
    ks = jax.random.split(key, 5)
    c1, c2 = 4 * wider_factor, 16 * wider_factor
    f8_in = wider_factor * 16 * 5 * 5
    f8_out, f10_out = 256 * wider_factor, 128 * wider_factor

    def kaiming_fan_out(k, shape):  # Conv2d: kaiming_normal_, mode='fan_out', relu
        fan_out = shape[0] * shape[2] * shape[3]
        return jax.random.normal(k, shape, jnp.float32) * jnp.sqrt(2.0 / fan_out)

    return dict(
        conv1_w=kaiming_fan_out(ks[0], (c1, n_channels, 5, 5)),
        conv1_b=jnp.zeros((c1,), jnp.float32),     # kept for fidelity; cancelled by BN
        conv4_w=kaiming_fan_out(ks[1], (c2, c1, 5, 5)),
        conv4_b=jnp.zeros((c2,), jnp.float32),
        fc8_w=jax.random.normal(ks[2], (f8_out, f8_in), jnp.float32) * 0.01,
        fc8_b=jnp.zeros((f8_out,), jnp.float32),
        fc10_w=jax.random.normal(ks[3], (f10_out, f8_out), jnp.float32) * 0.01,
        fc10_b=jnp.zeros((f10_out,), jnp.float32),
        fc12_w=jax.random.normal(ks[4], (num_classes, f10_out), jnp.float32) * 0.01,
        fc12_b=jnp.zeros((num_classes,), jnp.float32),
    )


if __name__ == "__main__":
    key = jax.random.PRNGKey(0)
    pkey, xkey = jax.random.split(key)

    # Small config: wider_factor=1, n_channels=1, 32x32 input (LeNet geometry implied by
    # fc8 in_features = wf*16*5*5), batch=2.
    params = init_params(pkey, num_classes=10, wider_factor=1, n_channels=1)
    prep = prepare_params(params)                 # one-time weight re-layout, outside jit
    x = jax.random.normal(xkey, (2, 1, 32, 32), jnp.float32)  # NCHW like PyTorch

    fwd = jax.jit(lenet5_bn_forward, static_argnames=("num_classes",))
    out = jax.block_until_ready(fwd(prep, x, num_classes=10))
    assert out.shape == (2, 10) and out.dtype == jnp.float32
    assert bool(jnp.all(jnp.isfinite(out)))
    print("KERNEL_OK")
</pallas_src>

<mosaic_0001>
module attributes {stable_mosaic.version = 11 : i64} {
  func.func @_lenet5_bn_fused_kernel(%arg0: memref<280x32xbf16, #tpu.memory_space<vmem>>, %arg1: memref<160x112xbf16, #tpu.memory_space<vmem>>, %arg2: memref<112x4xf32, #tpu.memory_space<vmem>>, %arg3: memref<4x112xf32, #tpu.memory_space<vmem>>, %arg4: memref<280x160xbf16, #tpu.memory_space<vmem>>, %arg5: memref<160x16xf32, #tpu.memory_space<vmem>>, %arg6: memref<16x160xf32, #tpu.memory_space<vmem>>, %arg7: memref<400x256xbf16, #tpu.memory_space<vmem>>, %arg8: memref<1x256xf32, #tpu.memory_space<vmem>>, %arg9: memref<256x128xbf16, #tpu.memory_space<vmem>>, %arg10: memref<1x128xf32, #tpu.memory_space<vmem>>, %arg11: memref<128x128xbf16, #tpu.memory_space<vmem>>, %arg12: memref<1x128xf32, #tpu.memory_space<vmem>>, %arg13: memref<2x128xf32, #tpu.memory_space<vmem>>) attributes {dimension_semantics = [], scalar_prefetch = 0 : i64, scratch_operands = 0 : i64, tpu.core_type = #tpu.core_type<tc>} {
    %c0 = arith.constant 0 : index
    %c0_0 = arith.constant 0 : index
    %0 = vector.load %arg0[%c0, %c0_0] : memref<280x32xbf16, #tpu.memory_space<vmem>>, vector<280x32xbf16>
    %c0_1 = arith.constant 0 : index
    %c0_2 = arith.constant 0 : index
    %1 = vector.load %arg1[%c0_1, %c0_2] : memref<160x112xbf16, #tpu.memory_space<vmem>>, vector<160x112xbf16>
    %2 = vector.extract_strided_slice %0 {offsets = [0, 0], sizes = [56, 32], strides = [1, 1]} : vector<280x32xbf16> to vector<56x32xbf16>
    %3 = vector.extract_strided_slice %1 {offsets = [0, 0], sizes = [32, 112], strides = [1, 1]} : vector<160x112xbf16> to vector<32x112xbf16>
    %cst = arith.constant dense<0.000000e+00> : vector<56x112xf32>
    %4 = tpu.matmul %2, %3, %cst {dimension_numbers = #tpu.dot_dimension_numbers<[1], [0], [0], [1], [0, 0, 1, 1], [], []>} : vector<56x32xbf16>, vector<32x112xbf16>, vector<56x112xf32> -> vector<56x112xf32>
    %5 = vector.extract_strided_slice %0 {offsets = [56, 0], sizes = [56, 32], strides = [1, 1]} : vector<280x32xbf16> to vector<56x32xbf16>
    %6 = vector.extract_strided_slice %1 {offsets = [32, 0], sizes = [32, 112], strides = [1, 1]} : vector<160x112xbf16> to vector<32x112xbf16>
    %cst_3 = arith.constant dense<0.000000e+00> : vector<56x112xf32>
    %7 = tpu.matmul %5, %6, %cst_3 {dimension_numbers = #tpu.dot_dimension_numbers<[1], [0], [0], [1], [0, 0, 1, 1], [], []>} : vector<56x32xbf16>, vector<32x112xbf16>, vector<56x112xf32> -> vector<56x112xf32>
    %8 = arith.addf %4, %7 : vector<56x112xf32>
    %9 = vector.extract_strided_slice %0 {offsets = [112, 0], sizes = [56, 32], strides = [1, 1]} : vector<280x32xbf16> to vector<56x32xbf16>
    %10 = vector.extract_strided_slice %1 {offsets = [64, 0], sizes = [32, 112], strides = [1, 1]} : vector<160x112xbf16> to vector<32x112xbf16>
    %cst_4 = arith.constant dense<0.000000e+00> : vector<56x112xf32>
    %11 = tpu.matmul %9, %10, %cst_4 {dimension_numbers = #tpu.dot_dimension_numbers<[1], [0], [0], [1], [0, 0, 1, 1], [], []>} : vector<56x32xbf16>, vector<32x112xbf16>, vector<56x112xf32> -> vector<56x112xf32>
    %12 = arith.addf %8, %11 : vector<56x112xf32>
    %13 = vector.extract_strided_slice %0 {offsets = [168, 0], sizes = [56, 32], strides = [1, 1]} : vector<280x32xbf16> to vector<56x32xbf16>
    %14 = vector.extract_strided_slice %1 {offsets = [96, 0], sizes = [32, 112], strides = [1, 1]} : vector<160x112xbf16> to vector<32x112xbf16>
    %cst_5 = arith.constant dense<0.000000e+00> : vector<56x112xf32>
    %15 = tpu.matmul %13, %14, %cst_5 {dimension_numbers = #tpu.dot_dimension_numbers<[1], [0], [0], [1], [0, 0, 1, 1], [], []>} : vector<56x32xbf16>, vector<32x112xbf16>, vector<56x112xf32> -> vector<56x112xf32>
    %16 = arith.addf %12, %15 : vector<56x112xf32>
    %17 = vector.extract_strided_slice %0 {offsets = [224, 0], sizes = [56, 32], strides = [1, 1]} : vector<280x32xbf16> to vector<56x32xbf16>
    %18 = vector.extract_strided_slice %1 {offsets = [128, 0], sizes = [32, 112], strides = [1, 1]} : vector<160x112xbf16> to vector<32x112xbf16>
    %cst_6 = arith.constant dense<0.000000e+00> : vector<56x112xf32>
    %19 = tpu.matmul %17, %18, %cst_6 {dimension_numbers = #tpu.dot_dimension_numbers<[1], [0], [0], [1], [0, 0, 1, 1], [], []>} : vector<56x32xbf16>, vector<32x112xbf16>, vector<56x112xf32> -> vector<56x112xf32>
    %20 = arith.addf %16, %19 : vector<56x112xf32>
    %c0_7 = arith.constant 0 : index
    %c0_8 = arith.constant 0 : index
    %21 = vector.load %arg2[%c0_7, %c0_8] : memref<112x4xf32, #tpu.memory_space<vmem>>, vector<112x4xf32>
    %c0_9 = arith.constant 0 : index
    %c0_10 = arith.constant 0 : index
    %22 = vector.load %arg3[%c0_9, %c0_10] : memref<4x112xf32, #tpu.memory_space<vmem>>, vector<4x112xf32>
    %cst_11 = arith.constant dense<0.000000e+00> : vector<112xf32>
    %23 = vector.multi_reduction <add>, %20, %cst_11 [0] : vector<56x112xf32> to vector<112xf32>
    %24 = vector.shape_cast %23 : vector<112xf32> to vector<1x112xf32>
    %cst_12 = arith.constant dense<0.000000e+00> : vector<1x4xf32>
    %25 = tpu.matmul %24, %21, %cst_12 {dimension_numbers = #tpu.dot_dimension_numbers<[1], [0], [0], [1], [0, 0, 1, 1], [], []>} : vector<1x112xf32>, vector<112x4xf32>, vector<1x4xf32> -> vector<1x4xf32>
    %cst_13 = arith.constant 6.37755089E-4 : f32
    %26 = vector.broadcast %cst_13 : f32 to vector<1x4xf32>
    %27 = arith.mulf %25, %26 : vector<1x4xf32>
    %cst_14 = arith.constant dense<0.000000e+00> : vector<1x112xf32>
    %28 = tpu.matmul %27, %22, %cst_14 {dimension_numbers = #tpu.dot_dimension_numbers<[1], [0], [0], [1], [0, 0, 1, 1], [], []>} : vector<1x4xf32>, vector<4x112xf32>, vector<1x112xf32> -> vector<1x112xf32>
    %29 = vector.broadcast %28 : vector<1x112xf32> to vector<56x112xf32>
    %30 = arith.subf %20, %29 : vector<56x112xf32>
    %31 = arith.mulf %30, %30 : vector<56x112xf32>
    %cst_15 = arith.constant dense<0.000000e+00> : vector<112xf32>
    %32 = vector.multi_reduction <add>, %31, %cst_15 [0] : vector<56x112xf32> to vector<112xf32>
    %33 = vector.shape_cast %32 : vector<112xf32> to vector<1x112xf32>
    %cst_16 = arith.constant dense<0.000000e+00> : vector<1x4xf32>
    %34 = tpu.matmul %33, %21, %cst_16 {dimension_numbers = #tpu.dot_dimension_numbers<[1], [0], [0], [1], [0, 0, 1, 1], [], []>} : vector<1x112xf32>, vector<112x4xf32>, vector<1x4xf32> -> vector<1x4xf32>
    %cst_17 = arith.constant 6.37755089E-4 : f32
    %35 = vector.broadcast %cst_17 : f32 to vector<1x4xf32>
    %36 = arith.mulf %34, %35 : vector<1x4xf32>
    %cst_18 = arith.constant 9.99999974E-6 : f32
    %37 = vector.broadcast %cst_18 : f32 to vector<1x4xf32>
    %38 = arith.addf %36, %37 : vector<1x4xf32>
    %39 = math.rsqrt %38 : vector<1x4xf32>
    %cst_19 = arith.constant 0.000000e+00 : f32
    %40 = vector.broadcast %cst_19 : f32 to vector<1x4xf32>
    %41 = arith.subf %40, %27 : vector<1x4xf32>
    %42 = arith.mulf %41, %39 : vector<1x4xf32>
    %43 = vector.extract_strided_slice %20 {offsets = [0, 0], sizes = [28, 56], strides = [1, 1]} : vector<56x112xf32> to vector<28x56xf32>
    %44 = vector.extract_strided_slice %20 {offsets = [0, 56], sizes = [28, 56], strides = [1, 1]} : vector<56x112xf32> to vector<28x56xf32>
    %45 = arith.maximumf %43, %44 : vector<28x56xf32>
    %46 = vector.extract_strided_slice %20 {offsets = [28, 0], sizes = [28, 56], strides = [1, 1]} : vector<56x112xf32> to vector<28x56xf32>
    %47 = vector.extract_strided_slice %20 {offsets = [28, 56], sizes = [28, 56], strides = [1, 1]} : vector<56x112xf32> to vector<28x56xf32>
    %48 = arith.maximumf %46, %47 : vector<28x56xf32>
    %49 = arith.maximumf %45, %48 : vector<28x56xf32>
    %50 = vector.extract_strided_slice %22 {offsets = [0, 0], sizes = [4, 56], strides = [1, 1]} : vector<4x112xf32> to vector<4x56xf32>
    %cst_20 = arith.constant dense<0.000000e+00> : vector<1x56xf32>
    %51 = tpu.matmul %39, %50, %cst_20 {dimension_numbers = #tpu.dot_dimension_numbers<[1], [0], [0], [1], [0, 0, 1, 1], [], []>} : vector<1x4xf32>, vector<4x56xf32>, vector<1x56xf32> -> vector<1x56xf32>
    %52 = vector.extract_strided_slice %22 {offsets = [0, 0], sizes = [4, 56], strides = [1, 1]} : vector<4x112xf32> to vector<4x56xf32>
    %cst_21 = arith.constant dense<0.000000e+00> : vector<1x56xf32>
    %53 = tpu.matmul %42, %52, %cst_21 {dimension_numbers = #tpu.dot_dimension_numbers<[1], [0], [0], [1], [0, 0, 1, 1], [], []>} : vector<1x4xf32>, vector<4x56xf32>, vector<1x56xf32> -> vector<1x56xf32>
    %54 = vector.broadcast %51 : vector<1x56xf32> to vector<28x56xf32>
    %55 = arith.mulf %49, %54 : vector<28x56xf32>
    %56 = vector.broadcast %53 : vector<1x56xf32> to vector<28x56xf32>
    %57 = arith.addf %55, %56 : vector<28x56xf32>
    %cst_22 = arith.constant 0.000000e+00 : f32
    %58 = vector.broadcast %cst_22 : f32 to vector<28x56xf32>
    %59 = arith.maximumf %57, %58 : vector<28x56xf32>
    %60 = arith.truncf %59 : vector<28x56xf32> to vector<28x56xbf16>
    %c0_23 = arith.constant 0 : index
    %c0_24 = arith.constant 0 : index
    %61 = vector.load %arg4[%c0_23, %c0_24] : memref<280x160xbf16, #tpu.memory_space<vmem>>, vector<280x160xbf16>
    %62 = vector.extract_strided_slice %60 {offsets = [0, 0], sizes = [10, 56], strides = [1, 1]} : vector<28x56xbf16> to vector<10x56xbf16>
    %63 = vector.extract_strided_slice %61 {offsets = [0, 0], sizes = [56, 160], strides = [1, 1]} : vector<280x160xbf16> to vector<56x160xbf16>
    %cst_25 = arith.constant dense<0.000000e+00> : vector<10x160xf32>
    %64 = tpu.matmul %62, %63, %cst_25 {dimension_numbers = #tpu.dot_dimension_numbers<[1], [0], [0], [1], [0, 0, 1, 1], [], []>} : vector<10x56xbf16>, vector<56x160xbf16>, vector<10x160xf32> -> vector<10x160xf32>
    %65 = vector.extract_strided_slice %60 {offsets = [14, 0], sizes = [10, 56], strides = [1, 1]} : vector<28x56xbf16> to vector<10x56xbf16>
    %66 = vector.extract_strided_slice %61 {offsets = [56, 0], sizes = [56, 160], strides = [1, 1]} : vector<280x160xbf16> to vector<56x160xbf16>
    %cst_26 = arith.constant dense<0.000000e+00> : vector<10x160xf32>
    %67 = tpu.matmul %65, %66, %cst_26 {dimension_numbers = #tpu.dot_dimension_numbers<[1], [0], [0], [1], [0, 0, 1, 1], [], []>} : vector<10x56xbf16>, vector<56x160xbf16>, vector<10x160xf32> -> vector<10x160xf32>
    %68 = arith.addf %64, %67 : vector<10x160xf32>
    %69 = vector.extract_strided_slice %60 {offsets = [2, 0], sizes = [10, 56], strides = [1, 1]} : vector<28x56xbf16> to vector<10x56xbf16>
    %70 = vector.extract_strided_slice %61 {offsets = [112, 0], sizes = [56, 160], strides = [1, 1]} : vector<280x160xbf16> to vector<56x160xbf16>
    %cst_27 = arith.constant dense<0.000000e+00> : vector<10x160xf32>
    %71 = tpu.matmul %69, %70, %cst_27 {dimension_numbers = #tpu.dot_dimension_numbers<[1], [0], [0], [1], [0, 0, 1, 1], [], []>} : vector<10x56xbf16>, vector<56x160xbf16>, vector<10x160xf32> -> vector<10x160xf32>
    %72 = arith.addf %68, %71 : vector<10x160xf32>
    %73 = vector.extract_strided_slice %60 {offsets = [16, 0], sizes = [10, 56], strides = [1, 1]} : vector<28x56xbf16> to vector<10x56xbf16>
    %74 = vector.extract_strided_slice %61 {offsets = [168, 0], sizes = [56, 160], strides = [1, 1]} : vector<280x160xbf16> to vector<56x160xbf16>
    %cst_28 = arith.constant dense<0.000000e+00> : vector<10x160xf32>
    %75 = tpu.matmul %73, %74, %cst_28 {dimension_numbers = #tpu.dot_dimension_numbers<[1], [0], [0], [1], [0, 0, 1, 1], [], []>} : vector<10x56xbf16>, vector<56x160xbf16>, vector<10x160xf32> -> vector<10x160xf32>
    %76 = arith.addf %72, %75 : vector<10x160xf32>
    %77 = vector.extract_strided_slice %60 {offsets = [4, 0], sizes = [10, 56], strides = [1, 1]} : vector<28x56xbf16> to vector<10x56xbf16>
    %78 = vector.extract_strided_slice %61 {offsets = [224, 0], sizes = [56, 160], strides = [1, 1]} : vector<280x160xbf16> to vector<56x160xbf16>
    %cst_29 = arith.constant dense<0.000000e+00> : vector<10x160xf32>
    %79 = tpu.matmul %77, %78, %cst_29 {dimension_numbers = #tpu.dot_dimension_numbers<[1], [0], [0], [1], [0, 0, 1, 1], [], []>} : vector<10x56xbf16>, vector<56x160xbf16>, vector<10x160xf32> -> vector<10x160xf32>
    %80 = arith.addf %76, %79 : vector<10x160xf32>
    %81 = vector.extract_strided_slice %60 {offsets = [14, 0], sizes = [10, 56], strides = [1, 1]} : vector<28x56xbf16> to vector<10x56xbf16>
    %82 = vector.extract_strided_slice %61 {offsets = [0, 0], sizes = [56, 160], strides = [1, 1]} : vector<280x160xbf16> to vector<56x160xbf16>
    %cst_30 = arith.constant dense<0.000000e+00> : vector<10x160xf32>
    %83 = tpu.matmul %81, %82, %cst_30 {dimension_numbers = #tpu.dot_dimension_numbers<[1], [0], [0], [1], [0, 0, 1, 1], [], []>} : vector<10x56xbf16>, vector<56x160xbf16>, vector<10x160xf32> -> vector<10x160xf32>
    %84 = vector.extract_strided_slice %60 {offsets = [2, 0], sizes = [10, 56], strides = [1, 1]} : vector<28x56xbf16> to vector<10x56xbf16>
    %85 = vector.extract_strided_slice %61 {offsets = [56, 0], sizes = [56, 160], strides = [1, 1]} : vector<280x160xbf16> to vector<56x160xbf16>
    %cst_31 = arith.constant dense<0.000000e+00> : vector<10x160xf32>
    %86 = tpu.matmul %84, %85, %cst_31 {dimension_numbers = #tpu.dot_dimension_numbers<[1], [0], [0], [1], [0, 0, 1, 1], [], []>} : vector<10x56xbf16>, vector<56x160xbf16>, vector<10x160xf32> -> vector<10x160xf32>
    %87 = arith.addf %83, %86 : vector<10x160xf32>
    %88 = vector.extract_strided_slice %60 {offsets = [16, 0], sizes = [10, 56], strides = [1, 1]} : vector<28x56xbf16> to vector<10x56xbf16>
    %89 = vector.extract_strided_slice %61 {offsets = [112, 0], sizes = [56, 160], strides = [1, 1]} : vector<280x160xbf16> to vector<56x160xbf16>
    %cst_32 = arith.constant dense<0.000000e+00> : vector<10x160xf32>
    %90 = tpu.matmul %88, %89, %cst_32 {dimension_numbers = #tpu.dot_dimension_numbers<[1], [0], [0], [1], [0, 0, 1, 1], [], []>} : vector<10x56xbf16>, vector<56x160xbf16>, vector<10x160xf32> -> vector<10x160xf32>
    %91 = arith.addf %87, %90 : vector<10x160xf32>
    %92 = vector.extract_strided_slice %60 {offsets = [4, 0], sizes = [10, 56], strides = [1, 1]} : vector<28x56xbf16> to vector<10x56xbf16>
    %93 = vector.extract_strided_slice %61 {offsets = [168, 0], sizes = [56, 160], strides = [1, 1]} : vector<280x160xbf16> to vector<56x160xbf16>
    %cst_33 = arith.constant dense<0.000000e+00> : vector<10x160xf32>
    %94 = tpu.matmul %92, %93, %cst_33 {dimension_numbers = #tpu.dot_dimension_numbers<[1], [0], [0], [1], [0, 0, 1, 1], [], []>} : vector<10x56xbf16>, vector<56x160xbf16>, vector<10x160xf32> -> vector<10x160xf32>
    %95 = arith.addf %91, %94 : vector<10x160xf32>
    %96 = vector.extract_strided_slice %60 {offsets = [18, 0], sizes = [10, 56], strides = [1, 1]} : vector<28x56xbf16> to vector<10x56xbf16>
    %97 = vector.extract_strided_slice %61 {offsets = [224, 0], sizes = [56, 160], strides = [1, 1]} : vector<280x160xbf16> to vector<56x160xbf16>
    %cst_34 = arith.constant dense<0.000000e+00> : vector<10x160xf32>
    %98 = tpu.matmul %96, %97, %cst_34 {dimension_numbers = #tpu.dot_dimension_numbers<[1], [0], [0], [1], [0, 0, 1, 1], [], []>} : vector<10x56xbf16>, vector<56x160xbf16>, vector<10x160xf32> -> vector<10x160xf32>
    %99 = arith.addf %95, %98 : vector<10x160xf32>
    %c0_35 = arith.constant 0 : index
    %c0_36 = arith.constant 0 : index
    %100 = vector.load %arg5[%c0_35, %c0_36] : memref<160x16xf32, #tpu.memory_space<vmem>>, vector<160x16xf32>
    %c0_37 = arith.constant 0 : index
    %c0_38 = arith.constant 0 : index
    %101 = vector.load %arg6[%c0_37, %c0_38] : memref<16x160xf32, #tpu.memory_space<vmem>>, vector<16x160xf32>
    %cst_39 = arith.constant dense<0.000000e+00> : vector<160xf32>
    %102 = vector.multi_reduction <add>, %80, %cst_39 [0] : vector<10x160xf32> to vector<160xf32>
    %103 = vector.shape_cast %102 : vector<160xf32> to vector<1x160xf32>
    %cst_40 = arith.constant dense<0.000000e+00> : vector<160xf32>
    %104 = vector.multi_reduction <add>, %99, %cst_40 [0] : vector<10x160xf32> to vector<160xf32>
    %105 = vector.shape_cast %104 : vector<160xf32> to vector<1x160xf32>
    %106 = arith.addf %103, %105 : vector<1x160xf32>
    %cst_41 = arith.constant dense<0.000000e+00> : vector<1x16xf32>
    %107 = tpu.matmul %106, %100, %cst_41 {dimension_numbers = #tpu.dot_dimension_numbers<[1], [0], [0], [1], [0, 0, 1, 1], [], []>} : vector<1x160xf32>, vector<160x16xf32>, vector<1x16xf32> -> vector<1x16xf32>
    %cst_42 = arith.constant 5.000000e-03 : f32
    %108 = vector.broadcast %cst_42 : f32 to vector<1x16xf32>
    %109 = arith.mulf %107, %108 : vector<1x16xf32>
    %cst_43 = arith.constant dense<0.000000e+00> : vector<1x160xf32>
    %110 = tpu.matmul %109, %101, %cst_43 {dimension_numbers = #tpu.dot_dimension_numbers<[1], [0], [0], [1], [0, 0, 1, 1], [], []>} : vector<1x16xf32>, vector<16x160xf32>, vector<1x160xf32> -> vector<1x160xf32>
    %111 = vector.broadcast %110 : vector<1x160xf32> to vector<10x160xf32>
    %112 = arith.subf %80, %111 : vector<10x160xf32>
    %113 = vector.broadcast %110 : vector<1x160xf32> to vector<10x160xf32>
    %114 = arith.subf %99, %113 : vector<10x160xf32>
    %115 = arith.mulf %112, %112 : vector<10x160xf32>
    %cst_44 = arith.constant dense<0.000000e+00> : vector<160xf32>
    %116 = vector.multi_reduction <add>, %115, %cst_44 [0] : vector<10x160xf32> to vector<160xf32>
    %117 = vector.shape_cast %116 : vector<160xf32> to vector<1x160xf32>
    %118 = arith.mulf %114, %114 : vector<10x160xf32>
    %cst_45 = arith.constant dense<0.000000e+00> : vector<160xf32>
    %119 = vector.multi_reduction <add>, %118, %cst_45 [0] : vector<10x160xf32> to vector<160xf32>
    %120 = vector.shape_cast %119 : vector<160xf32> to vector<1x160xf32>
    %121 = arith.addf %117, %120 : vector<1x160xf32>
    %cst_46 = arith.constant dense<0.000000e+00> : vector<1x16xf32>
    %122 = tpu.matmul %121, %100, %cst_46 {dimension_numbers = #tpu.dot_dimension_numbers<[1], [0], [0], [1], [0, 0, 1, 1], [], []>} : vector<1x160xf32>, vector<160x16xf32>, vector<1x16xf32> -> vector<1x16xf32>
    %cst_47 = arith.constant 5.000000e-03 : f32
    %123 = vector.broadcast %cst_47 : f32 to vector<1x16xf32>
    %124 = arith.mulf %122, %123 : vector<1x16xf32>
    %cst_48 = arith.constant 9.99999974E-6 : f32
    %125 = vector.broadcast %cst_48 : f32 to vector<1x16xf32>
    %126 = arith.addf %124, %125 : vector<1x16xf32>
    %127 = math.rsqrt %126 : vector<1x16xf32>
    %cst_49 = arith.constant 0.000000e+00 : f32
    %128 = vector.broadcast %cst_49 : f32 to vector<1x16xf32>
    %129 = arith.subf %128, %109 : vector<1x16xf32>
    %130 = arith.mulf %129, %127 : vector<1x16xf32>
    %131 = vector.extract_strided_slice %80 {offsets = [0, 0], sizes = [10, 80], strides = [1, 1]} : vector<10x160xf32> to vector<10x80xf32>
    %132 = vector.extract_strided_slice %80 {offsets = [0, 80], sizes = [10, 80], strides = [1, 1]} : vector<10x160xf32> to vector<10x80xf32>
    %133 = arith.maximumf %131, %132 : vector<10x80xf32>
    %134 = vector.extract_strided_slice %99 {offsets = [0, 0], sizes = [10, 80], strides = [1, 1]} : vector<10x160xf32> to vector<10x80xf32>
    %135 = vector.extract_strided_slice %99 {offsets = [0, 80], sizes = [10, 80], strides = [1, 1]} : vector<10x160xf32> to vector<10x80xf32>
    %136 = arith.maximumf %134, %135 : vector<10x80xf32>
    %137 = arith.maximumf %133, %136 : vector<10x80xf32>
    %138 = vector.extract_strided_slice %101 {offsets = [0, 0], sizes = [16, 80], strides = [1, 1]} : vector<16x160xf32> to vector<16x80xf32>
    %cst_50 = arith.constant dense<0.000000e+00> : vector<1x80xf32>
    %139 = tpu.matmul %127, %138, %cst_50 {dimension_numbers = #tpu.dot_dimension_numbers<[1], [0], [0], [1], [0, 0, 1, 1], [], []>} : vector<1x16xf32>, vector<16x80xf32>, vector<1x80xf32> -> vector<1x80xf32>
    %140 = vector.extract_strided_slice %101 {offsets = [0, 0], sizes = [16, 80], strides = [1, 1]} : vector<16x160xf32> to vector<16x80xf32>
    %cst_51 = arith.constant dense<0.000000e+00> : vector<1x80xf32>
    %141 = tpu.matmul %130, %140, %cst_51 {dimension_numbers = #tpu.dot_dimension_numbers<[1], [0], [0], [1], [0, 0, 1, 1], [], []>} : vector<1x16xf32>, vector<16x80xf32>, vector<1x80xf32> -> vector<1x80xf32>
    %142 = vector.broadcast %139 : vector<1x80xf32> to vector<10x80xf32>
    %143 = arith.mulf %137, %142 : vector<10x80xf32>
    %144 = vector.broadcast %141 : vector<1x80xf32> to vector<10x80xf32>
    %145 = arith.addf %143, %144 : vector<10x80xf32>
    %cst_52 = arith.constant 0.000000e+00 : f32
    %146 = vector.broadcast %cst_52 : f32 to vector<10x80xf32>
    %147 = arith.maximumf %145, %146 : vector<10x80xf32>
    %148 = arith.truncf %147 : vector<10x80xf32> to vector<10x80xbf16>
    %c0_53 = arith.constant 0 : index
    %c0_54 = arith.constant 0 : index
    %149 = vector.load %arg7[%c0_53, %c0_54] : memref<400x256xbf16, #tpu.memory_space<vmem>>, vector<400x256xbf16>
    %150 = vector.extract_strided_slice %148 {offsets = [0, 0], sizes = [2, 80], strides = [1, 1]} : vector<10x80xbf16> to vector<2x80xbf16>
    %151 = vector.extract_strided_slice %149 {offsets = [0, 0], sizes = [80, 256], strides = [1, 1]} : vector<400x256xbf16> to vector<80x256xbf16>
    %cst_55 = arith.constant dense<0.000000e+00> : vector<2x256xf32>
    %152 = tpu.matmul %150, %151, %cst_55 {dimension_numbers = #tpu.dot_dimension_numbers<[1], [0], [0], [1], [0, 0, 1, 1], [], []>} : vector<2x80xbf16>, vector<80x256xbf16>, vector<2x256xf32> -> vector<2x256xf32>
    %153 = vector.extract_strided_slice %148 {offsets = [2, 0], sizes = [2, 80], strides = [1, 1]} : vector<10x80xbf16> to vector<2x80xbf16>
    %154 = vector.extract_strided_slice %149 {offsets = [80, 0], sizes = [80, 256], strides = [1, 1]} : vector<400x256xbf16> to vector<80x256xbf16>
    %cst_56 = arith.constant dense<0.000000e+00> : vector<2x256xf32>
    %155 = tpu.matmul %153, %154, %cst_56 {dimension_numbers = #tpu.dot_dimension_numbers<[1], [0], [0], [1], [0, 0, 1, 1], [], []>} : vector<2x80xbf16>, vector<80x256xbf16>, vector<2x256xf32> -> vector<2x256xf32>
    %156 = arith.addf %152, %155 : vector<2x256xf32>
    %157 = vector.extract_strided_slice %148 {offsets = [4, 0], sizes = [2, 80], strides = [1, 1]} : vector<10x80xbf16> to vector<2x80xbf16>
    %158 = vector.extract_strided_slice %149 {offsets = [160, 0], sizes = [80, 256], strides = [1, 1]} : vector<400x256xbf16> to vector<80x256xbf16>
    %cst_57 = arith.constant dense<0.000000e+00> : vector<2x256xf32>
    %159 = tpu.matmul %157, %158, %cst_57 {dimension_numbers = #tpu.dot_dimension_numbers<[1], [0], [0], [1], [0, 0, 1, 1], [], []>} : vector<2x80xbf16>, vector<80x256xbf16>, vector<2x256xf32> -> vector<2x256xf32>
    %160 = arith.addf %156, %159 : vector<2x256xf32>
    %161 = vector.extract_strided_slice %148 {offsets = [6, 0], sizes = [2, 80], strides = [1, 1]} : vector<10x80xbf16> to vector<2x80xbf16>
    %162 = vector.extract_strided_slice %149 {offsets = [240, 0], sizes = [80, 256], strides = [1, 1]} : vector<400x256xbf16> to vector<80x256xbf16>
    %cst_58 = arith.constant dense<0.000000e+00> : vector<2x256xf32>
    %163 = tpu.matmul %161, %162, %cst_58 {dimension_numbers = #tpu.dot_dimension_numbers<[1], [0], [0], [1], [0, 0, 1, 1], [], []>} : vector<2x80xbf16>, vector<80x256xbf16>, vector<2x256xf32> -> vector<2x256xf32>
    %164 = arith.addf %160, %163 : vector<2x256xf32>
    %165 = vector.extract_strided_slice %148 {offsets = [8, 0], sizes = [2, 80], strides = [1, 1]} : vector<10x80xbf16> to vector<2x80xbf16>
    %166 = vector.extract_strided_slice %149 {offsets = [320, 0], sizes = [80, 256], strides = [1, 1]} : vector<400x256xbf16> to vector<80x256xbf16>
    %cst_59 = arith.constant dense<0.000000e+00> : vector<2x256xf32>
    %167 = tpu.matmul %165, %166, %cst_59 {dimension_numbers = #tpu.dot_dimension_numbers<[1], [0], [0], [1], [0, 0, 1, 1], [], []>} : vector<2x80xbf16>, vector<80x256xbf16>, vector<2x256xf32> -> vector<2x256xf32>
    %168 = arith.addf %164, %167 : vector<2x256xf32>
    %c0_60 = arith.constant 0 : index
    %c0_61 = arith.constant 0 : index
    %169 = vector.load %arg8[%c0_60, %c0_61] : memref<1x256xf32, #tpu.memory_space<vmem>>, vector<1x256xf32>
    %170 = vector.broadcast %169 : vector<1x256xf32> to vector<2x256xf32>
    %171 = arith.addf %168, %170 : vector<2x256xf32>
    %cst_62 = arith.constant 0.000000e+00 : f32
    %172 = vector.broadcast %cst_62 : f32 to vector<2x256xf32>
    %173 = arith.maximumf %171, %172 : vector<2x256xf32>
    %174 = arith.truncf %173 : vector<2x256xf32> to vector<2x256xbf16>
    %c0_63 = arith.constant 0 : index
    %c0_64 = arith.constant 0 : index
    %175 = vector.load %arg9[%c0_63, %c0_64] : memref<256x128xbf16, #tpu.memory_space<vmem>>, vector<256x128xbf16>
    %cst_65 = arith.constant dense<0.000000e+00> : vector<2x128xf32>
    %176 = tpu.matmul %174, %175, %cst_65 {dimension_numbers = #tpu.dot_dimension_numbers<[1], [0], [0], [1], [0, 0, 1, 1], [], []>} : vector<2x256xbf16>, vector<256x128xbf16>, vector<2x128xf32> -> vector<2x128xf32>
    %c0_66 = arith.constant 0 : index
    %c0_67 = arith.constant 0 : index
    %177 = vector.load %arg10[%c0_66, %c0_67] : memref<1x128xf32, #tpu.memory_space<vmem>>, vector<1x128xf32>
    %178 = vector.broadcast %177 : vector<1x128xf32> to vector<2x128xf32>
    %179 = arith.addf %176, %178 : vector<2x128xf32>
    %cst_68 = arith.constant 0.000000e+00 : f32
    %180 = vector.broadcast %cst_68 : f32 to vector<2x128xf32>
    %181 = arith.maximumf %179, %180 : vector<2x128xf32>
    %182 = arith.truncf %181 : vector<2x128xf32> to vector<2x128xbf16>
    %c0_69 = arith.constant 0 : index
    %c0_70 = arith.constant 0 : index
    %183 = vector.load %arg11[%c0_69, %c0_70] : memref<128x128xbf16, #tpu.memory_space<vmem>>, vector<128x128xbf16>
    %cst_71 = arith.constant dense<0.000000e+00> : vector<2x128xf32>
    %184 = tpu.matmul %182, %183, %cst_71 {dimension_numbers = #tpu.dot_dimension_numbers<[1], [0], [0], [1], [0, 0, 1, 1], [], []>} : vector<2x128xbf16>, vector<128x128xbf16>, vector<2x128xf32> -> vector<2x128xf32>
    %c0_72 = arith.constant 0 : index
    %c0_73 = arith.constant 0 : index
    %185 = vector.load %arg12[%c0_72, %c0_73] : memref<1x128xf32, #tpu.memory_space<vmem>>, vector<1x128xf32>
    %186 = vector.broadcast %185 : vector<1x128xf32> to vector<2x128xf32>
    %187 = arith.addf %184, %186 : vector<2x128xf32>
    %c0_74 = arith.constant 0 : index
    %c0_75 = arith.constant 0 : index
    %188 = vector.load %arg13[%c0_74, %c0_75] : memref<2x128xf32, #tpu.memory_space<vmem>>, vector<2x128xf32>
    tpu.vector_store %arg13[%c0_74, %c0_75], %187 {strides = array<i32>} : memref<2x128xf32, #tpu.memory_space<vmem>>, vector<2x128xf32>,
    return
  }
}

</mosaic_0001>

<bundles_post_ra>
// kernel: lenet5_bn_forward.1
= control target key start
LH: loop header
LB: loop body
LE: loop exit
PB: predicated region body
PF: predicated region fallthrough
CT: control target
= control target key end

     0   :  { %vm131_vm0 = vcmask 261120   ;;  %s5220_s0 = inlined_call_operand.vmem [shape: bf16[280,32], index: 0, kind: input, shape index: {}]   ;;  %s5221_s1 = inlined_call_operand.vmem [shape: bf16[160,112], index: 1, kind: input, shape index: {}]   ;;  %s5222_s2 = inlined_call_operand.vmem [shape: f32[112,4], index: 2, kind: input, shape index: {}]   ;;  %s5223_s3 = inlined_call_operand.vmem [shape: f32[4,112], index: 3, kind: input, shape index: {}]   ;;  %s5224_s4 = inlined_call_operand.vmem [shape: bf16[280,160], index: 4, kind: input, shape index: {}]   ;;  %s5225_s5 = inlined_call_operand.vmem [shape: f32[160,16], index: 5, kind: input, shape index: {}]   ;;  %s5226_s6 = inlined_call_operand.vmem [shape: f32[16,160], index: 6, kind: input, shape index: {}]   ;;  %s5227_s7 = inlined_call_operand.vmem [shape: bf16[400,256], index: 7, kind: input, shape index: {}]   ;;  %s5228_s8 = inlined_call_operand.vmem [shape: f32[1,256], index: 8, kind: input, shape index: {}]   ;;  %s5229_s9 = inlined_call_operand.vmem [shape: bf16[256,128], index: 9, kind: input, shape index: {}]   ;;  %s5230_s10 = inlined_call_operand.vmem [shape: f32[1,128], index: 10, kind: input, shape index: {}]   ;;  %s5231_s11 = inlined_call_operand.vmem [shape: bf16[128,128], index: 11, kind: input, shape index: {}]   ;;  %s5232_s12 = inlined_call_operand.vmem [shape: f32[1,128], index: 12, kind: input, shape index: {}]   ;;  %s5233_s13 = inlined_call_operand.hbm [shape: f32[2,128], index: 13, kind: output, shape index: {}]  }
   0x1   :  { %v3962_v0 = vld [vmem:[%s5221_s1 + $0x10] sm:$0xff]   ;;  %v3963_v1 = vld [vmem:[%s5221_s1 + $0x18] sm:$0xff]   ;;  %v3966_v3 = vld [vmem:[%s5221_s1] sm:$0xff]  }
   0x2   :  { %3608 = vmatprep.subr.bf16.mxu0 %v3962_v0  ;;  %v3964_v2 = vld [vmem:[%s5220_s0 + $0x1c] sm:$0xff]   ;;  %v3965_v4 = vld [vmem:[%s5220_s0 + $0x24] sm:$0xff]   ;;  %v3967_v5 = vld [vmem:[%s5220_s0 + $0x2c] sm:$0xff]  }
   0x3   :  { %3609 = vmatpush3.bf16.msra.mxu0 %v3962_v0  ;;  %3612 = vmatprep.mubr.msk.bf16.mxu0 %vm131_vm0, %v3964_v2  ;;  %v3969_v6 = vld [vmem:[%s5221_s1 + $0x8] sm:$0xff]   ;;  %v3972_v7 = vld [vmem:[%s5221_s1 + $0x20] sm:$0xff]   ;;  %v3968_v8 = vld [vmem:[%s5220_s0 + $0x34] ss:$0 sps:$4 sm:$0xff]  }
   0x4   :  { %3610 = vmatprep.subr.bf16.mxu0 %v3963_v1  ;;  %v3970_v9 = vld [vmem:[%s5220_s0] sm:$0xff]   ;;  %v3971_v10 = vld [vmem:[%s5220_s0 + $0x8] sm:$0xff]   ;;  %v3973_v11 = vld [vmem:[%s5220_s0 + $0x10] sm:$0xff]  }
   0x5   :  { %v3975_v12 = vld [vmem:[%s5221_s1 + $0x28] sm:$0xff]   ;;  %v3974_v13 = vld [vmem:[%s5220_s0 + $0x18] ss:$0 sps:$4 sm:$0xff]   ;;  %v3978_v14 = vld [vmem:[%s5221_s1 + $0x30] sm:$0xff]  }
   0x6   :  { %v3976_v15 = vld [vmem:[%s5220_s0 + $0x38] sm:$0xff]   ;;  %v3977_v16 = vld [vmem:[%s5220_s0 + $0x40] sm:$0xff]   ;;  %v3979_v17 = vld [vmem:[%s5220_s0 + $0x48] sm:$0xff]  }
   0x7   :  { %3611 = vmatpush3.bf16.msra.mxu0 %v3963_v1  ;;  %v3981_v18 = vld [vmem:[%s5221_s1 + $0x38] sm:$0xff]   ;;  %v3984_v19 = vld [vmem:[%s5221_s1 + $0x40] sm:$0xff]   ;;  %v3980_v20 = vld [vmem:[%s5220_s0 + $0x50] ss:$0 sps:$4 sm:$0xff]  }
   0x8   :  { %3620 = vmatprep.subr.bf16.mxu0 %v3966_v3  ;;  %v3982_v21 = vld [vmem:[%s5220_s0 + $0x54] sm:$0xff]   ;;  %v3983_v22 = vld [vmem:[%s5220_s0 + $0x5c] sm:$0xff]   ;;  %v3985_v23 = vld [vmem:[%s5220_s0 + $0x64] sm:$0xff]  }
   0x9   :  { %v3987_v24 = vld [vmem:[%s5221_s1 + $0x48] sm:$0xff]   ;;  %v3988_v26 = vld [vmem:[%s5220_s0 + $0x70] sm:$0xff]   ;;  %v3989_v27 = vld [vmem:[%s5220_s0 + $0x78] sm:$0xff]  }
   0xa   :  { %3613 = vmatmul.mubr.msk.bf16.vlgmr.msra.gmra.mrb[0].mxu0 %vm131_vm0, %v3965_v4  ;;  %v3986_v25 = vld [vmem:[%s5220_s0 + $0x6c] ss:$0 sps:$4 sm:$0xff]   ;;  %v3990_v28 = vld [vmem:[%s5220_s0 + $0x80] sm:$0xff]  }
   0xb   :  { %3621 = vmatpush3.bf16.msra.mxu0 %v3966_v3  ;;  %3616 = vmatprep.mubr.msk.bf16.mxu0 %vm131_vm0, %v3967_v5 }
   0xc   :  { %3622 = vmatprep.subr.bf16.mxu0 %v3969_v6 }
   0xf   :  { %3623 = vmatpush3.bf16.msra.mxu0 %v3969_v6 }
  0x10   :  { %3632 = vmatprep.subr.bf16.mxu0 %v3972_v7 }
  0x12   :  { %3617 = vmatmul.mubr.msk.bf16.gmra.mrb[4].mxu0 %vm131_vm0, %v3968_v8 }
  0x13   :  { %3624 = vmatprep.mubr.msk.bf16.mxu0 %vm131_vm0, %v3970_v9 }
  0x1a   :  { %3625 = vmatmul.mubr.msk.bf16.vlgmr.msra.gmra.mrb[0].mxu0 %vm131_vm0, %v3971_v10 }
  0x1b   :  { %3633 = vmatpush3.bf16.msra.mxu0 %v3972_v7  ;;  %3628 = vmatprep.mubr.msk.bf16.mxu0 %vm131_vm0, %v3973_v11 }
  0x1c   :  { %3634 = vmatprep.subr.bf16.mxu0 %v3975_v12 }
  0x1f   :  { %3635 = vmatpush3.bf16.msra.mxu0 %v3975_v12 }
  0x20   :  { %3644 = vmatprep.subr.bf16.mxu0 %v3978_v14 }
  0x22   :  { %3629 = vmatmul.mubr.msk.bf16.gmra.mrb[4].mxu0 %vm131_vm0, %v3974_v13 }
  0x23   :  { %3636 = vmatprep.mubr.msk.bf16.mxu0 %vm131_vm0, %v3976_v15 }
  0x2a   :  { %3637 = vmatmul.mubr.msk.bf16.vlgmr.msra.gmra.mrb[0].mxu0 %vm131_vm0, %v3977_v16 }
  0x2b   :  { %3645 = vmatpush3.bf16.msra.mxu0 %v3978_v14  ;;  %3640 = vmatprep.mubr.msk.bf16.mxu0 %vm131_vm0, %v3979_v17 }
  0x2c   :  { %3646 = vmatprep.subr.bf16.mxu0 %v3981_v18 }
  0x2f   :  { %3647 = vmatpush3.bf16.msra.mxu0 %v3981_v18 }
  0x30   :  { %3656 = vmatprep.subr.bf16.mxu0 %v3984_v19 }
  0x32   :  { %3641 = vmatmul.mubr.msk.bf16.gmra.mrb[4].mxu0 %vm131_vm0, %v3980_v20 }
  0x33   :  { %3648 = vmatprep.mubr.msk.bf16.mxu0 %vm131_vm0, %v3982_v21 }
  0x3a   :  { %3649 = vmatmul.mubr.msk.bf16.vlgmr.msra.gmra.mrb[0].mxu0 %vm131_vm0, %v3983_v22 }
  0x3b   :  { %3657 = vmatpush3.bf16.msra.mxu0 %v3984_v19  ;;  %3652 = vmatprep.mubr.msk.bf16.mxu0 %vm131_vm0, %v3985_v23 }
  0x3c   :  { %3658 = vmatprep.subr.bf16.mxu0 %v3987_v24 }
  0x3f   :  { %3659 = vmatpush3.bf16.msra.mxu0 %v3987_v24 }
  0x42   :  { %3653 = vmatmul.mubr.msk.bf16.gmra.mrb[4].mxu0 %vm131_vm0, %v3986_v25 }
  0x43   :  { %3660 = vmatprep.mubr.msk.bf16.mxu0 %vm131_vm0, %v3988_v26 }
  0x44   :  { %18 = vsyncpa [#allocation3], 0  ;;  %v3991_v29 = vld [vmem:[%s5220_s0 + $0x88] ss:$0 sps:$4 sm:$0xff]   ;;  %v653_v30 = vld [vmem:[%s5222_s2] sm:$0xff]  ;;  %v4174_v33 = vmov 0.0|0.0  }
  0x45   :  { %v654_v31 = vld [vmem:[%s5222_s2 + $0x8] sm:$0xff]  ;;  %3779 = vmatprep.subr.bf16.mxu1 %v4174_v33  ;;  %v655_v34 = vld [vmem:[%s5222_s2 + $0x10] sm:$0xff]  ;;  %v656_v35 = vld [vmem:[%s5222_s2 + $0x18] sm:$0xff]  ;;  %vm4175_vm1 = vmmov 0   ;;  %v4176_v51 = vmov 0.0   ;;  %vm668_vm2 = vcmask 916480  }
  0x46   :  { %v4367_v32 = vpack.c.bf16 %v654_v31, %v653_v30  ;;  %v4378_v36 = vpack.c.bf16 %v656_v35, %v655_v34  ;;  %v657_v37 = vld [vmem:[%s5222_s2 + $0x20] sm:$0xff]  ;;  %v658_v38 = vld [vmem:[%s5222_s2 + $0x28] sm:$0xff]  ;;  %v659_v40 = vld [vmem:[%s5222_s2 + $0x30] sm:$0xff]  ;;  %3696 = vmatprep.mubr.msk.f32.mxu1 %vm4175_vm1, %v4176_v51  ;;  %vm766_vm3 = vcmask 1043456   ;;  %vm762_vm4 = vcmask 31744   ;;  %s4179_s1 = smov 48  }
  0x47   :  { %v4388_v39 = vpack.c.bf16 %v658_v38, %v657_v37  ;;  %v660_v41 = vld [vmem:[%s5222_s2 + $0x38] sm:$0xff]  ;;  %v661_v43 = vld [vmem:[%s5222_s2 + $0x40] sm:$0xff]  ;;  %v662_v44 = vld [vmem:[%s5222_s2 + $0x48] sm:$0xff]  ;;  %vm1253_vm5 = vcmask 457728   ;;  %vm1214_vm6 = vcmask 1040384   ;;  %vm1923_vm7 = vcmask 1041408  }
  0x48   :  { %3781 = vmatpush3.bf16.msra.mxu1 %v4367_v32  ;;  %v4398_v42 = vpack.c.bf16 %v660_v41, %v659_v40  ;;  %v4408_v45 = vpack.c.bf16 %v662_v44, %v661_v43  ;;  %v663_v46 = vld [vmem:[%s5222_s2 + $0x50] sm:$0xff]  ;;  %v664_v47 = vld [vmem:[%s5222_s2 + $0x58] sm:$0xff]  ;;  %v665_v48 = vld [vmem:[%s5222_s2 + $0x60] sm:$0xff]  ;;  %vm1933_vm8 = vcmask 254976   ;;  %vm2260_vm9 = vcmask 392192   ;;  %s4180_s21 = smov [#allocation2]  }
  0x49   :  { %3782 = vmatprep.subr.bf16.mxu1 %v4174_v33  ;;  %v4421_v49 = vpack.c.bf16 %v664_v47, %v663_v46  ;;  %v666_v50 = vld [vmem:[%s5222_s2 + $0x68] sm:$0xff]  ;;  %s4177_s2 = smov 72   ;;  %v4475_v16 = vld [vmem:[%s5223_s3] sm:$0xf]  ;;  %vm2035_vm10 = vcmask 130048   ;;  %vm2550_vm11 = vcmask 654336  }
  0x4a   :  { %3661 = vmatmul.mubr.msk.bf16.vlgmr.msra.gmra.mrb[0].mxu0 %vm131_vm0, %v3989_v27  ;;  %v4429_v52 = vpack.c.bf16 %v666_v50, %v665_v48 }
  0x4b   :  { %3664 = vmatprep.mubr.msk.bf16.mxu0 %vm131_vm0, %v3990_v28 }
  0x4c   :  { %3784 = vmatpush3.bf16.msra.mxu1 %v4378_v36 }
  0x4d   :  { %3785 = vmatprep.subr.bf16.mxu1 %v4174_v33 }
  0x50   :  { %3787 = vmatpush3.bf16.msra.mxu1 %v4388_v39 }
  0x51   :  { %3788 = vmatprep.subr.bf16.mxu1 %v4174_v33 }
  0x52   :  { %3665 = vmatmul.mubr.msk.bf16.gmra.mrb[4].mxu0 %vm131_vm0, %v3991_v29 }
  0x54   :  { %3790 = vmatpush3.bf16.msra.mxu1 %v4398_v42 }
  0x55   :  { %3791 = vmatprep.subr.bf16.mxu1 %v4174_v33 }
  0x58   :  { %3793 = vmatpush3.bf16.msra.mxu1 %v4408_v45 }
  0x59   :  { %3794 = vmatprep.subr.bf16.mxu1 %v4174_v33 }
  0x5c   :  { %3796 = vmatpush3.bf16.msra.mxu1 %v4421_v49 }
  0x5d   :  { %3797 = vmatprep.subr.bf16.mxu1 %v4174_v33 }
  0x60   :  { %3799 = vmatpush3.bf16.msra.mxu1 %v4429_v52 }
  0x61   :  { %3699 = vmatprep.subr.mxu1 %v4176_v51 }
 0x11d   :  { %v4434_v53 = vpop.f32.mrb[0].mxu0 }
 0x11e   :  { %v4436_v54 = vpop.f32.mrb[1].mxu0  ;;  %v672_v60 = vsel %vm668_vm2, %v4434_v53, 0.0 }
 0x11f   :  { %959 = vrot.lane.b32.xlu0 %v4436_v54, %s4177_s2  ;;  %v4439_v55 = vpop.f32.mrb[2].mxu0  ;;  %v669_v57 = vsel %vm668_vm2, %v4436_v54, 0.0 }
 0x120   :  { %v4441_v56 = vpop.f32.mrb[3].mxu0  ;;  %v674_v62 = vsel %vm668_vm2, %v4439_v55, 0.0 }
 0x121   :  { %v670_v58 = vsel %vm668_vm2, %v4441_v56, 0.0 }
 0x122   :  { %v671_v59 = vadd.f32 %v670_v58, %v669_v57 }
 0x123   :  { %965 = vrot.lane.b32.xlu0 %v4439_v55, %s4177_s2 }
 0x124   :  { %v673_v61 = vadd.f32 %v672_v60, %v671_v59 }
 0x125   :  { %v4452_v63 = vpop.f32.mrb[4].mxu0 }
 0x126   :  { %982 = vrot.lane.b32.xlu1 %v4452_v63, %s4177_s2  ;;  %v4455_v0 = vpop.f32.mrb[5].mxu0  ;;  %v675_v1 = vadd.f32 %v674_v62, %v673_v61  ;;  %v680_v8 = vsel %vm668_vm2, %v4452_v63, 0.0 }
 0x127   :  { %v676_v2 = vsel %vm668_vm2, %v4455_v0, 0.0  ;;  %978 = vrot.lane.b32.xlu0 %v4455_v0, %s4177_s2  ;;  %v3667_v3 = vpop.f32.mrb[6].mxu0 }
 0x128   :  { %v677_v4 = vadd.f32 %v676_v2, %v675_v1  ;;  %v4460_v5 = vpop.f32.mrb[7].mxu0 }
 0x129   :  { %v678_v6 = vsel %vm668_vm2, %v4460_v5, 0.0 }
 0x12a   :  { %v679_v7 = vadd.f32 %v678_v6, %v677_v4  ;;  %980 = vrot.lane.b32.xlu1 %v4460_v5, %s4177_s2 }
 0x12b   :  { %963 = vrot.lane.b32.xlu0 %v4434_v53, %s4177_s2 }
 0x12c   :  { %v681_v9 = vadd.f32 %v680_v8, %v679_v7 }
 0x12e   :  { %v682_v10 = vrot.slane %v681_v9, 4  ;;  %961 = vrot.lane.b32.xlu1 %v4441_v56, %s4177_s2 }
 0x130   :  { %v683_v11 = vadd.f32 %v682_v10, %v681_v9 }
 0x132   :  { %v684_v12 = vrot.slane %v683_v11, 2 }
 0x134   :  { %v685_v13 = vadd.f32 %v684_v12, %v683_v11 }
 0x136   :  { %v686_v14 = vrot.slane %v685_v13, 1 }
 0x138   :  { %v687_v15 = vadd.f32 %v686_v14, %v685_v13 }
 0x13a   :  { %3697 = vmatmul.mubr.msk.f32.vlgmr.msra.gmra.mrb[0].mxu1 %vm668_vm2, %v687_v15 }
 0x13b   :  { %3701 = vmatprep.mubr.msk.f32.mxu1 %vm4175_vm1, %v4176_v51  ;;  %3700 = vmatpush3.msk.msra.mxu1 %vm766_vm3, %v4475_v16 }
 0x13c   :  { %3800 = vmatprep.subr.bf16.mxu1 %v4174_v33 }
 0x191   :  { %v960_v17 = vpop.permute.xlu0 %959 }
 0x192   :  { %v971_v28 = vmax.f32 %v4436_v54, %v960_v17 }
 0x195   :  { %v966_v18 = vpop.permute.xlu0 %965 }
 0x196   :  { %v4481_v19 = vmax.f32 %v4439_v55, %v966_v18 }
 0x198   :  { %v983_v20 = vpop.permute.xlu1 %982  ;;  %v994_v25 = vrot.slane %v4481_v19, 4 }
 0x199   :  { %v989_v21 = vmax.f32 %v4452_v63, %v983_v20  ;;  %v979_v22 = vpop.permute.xlu0 %978 }
 0x19a   :  { %v987_v23 = vmax.f32 %v4455_v0, %v979_v22 }
 0x19b   :  { %v4485_v24 = vrot.slane %v989_v21, 4 }
 0x19c   :  { %v995_v26 = vrot.slane %v987_v23, 4  ;;  %v981_v27 = vpop.permute.xlu1 %980 }
 0x19d   :  { %v1008_v29 = vmax.f32 %v4481_v19, %v4485_v24  ;;  %v988_v30 = vmax.f32 %v4460_v5, %v981_v27  ;;  %v964_v31 = vpop.permute.xlu0 %963  ;;  %v4003_v19 = vld [vmem:[%s5224_s4] ss:$8 sps:$4 sm:$0xff]  }
 0x19e   :  { %v996_v34 = vsel %vm766_vm3, %v994_v25, %v995_v26  ;;  %v973_v38 = vmax.f32 %v4434_v53, %v964_v31  ;;  %v3992_v25 = vld [vmem:[%s5224_s4 + $0x38] ss:$8 sps:$4 sm:$0xff]  }
 0x19f   :  { %v4493_v35 = vmax.f32 %v971_v28, %v996_v34  ;;  %v997_v37 = vrot.slane %v988_v30, 4 }
 0x1a0   :  { %v962_v40 = vpop.permute.xlu1 %961 }
 0x1a1   :  { %v1000_v41 = vsel %vm766_vm3, %v997_v37, %v4485_v24  ;;  %v998_v43 = vsel %vm766_vm3, %v995_v26, %v997_v37  ;;  %v972_v44 = vmax.f32 %v4441_v56, %v962_v40  ;;  %v3994_v26 = vld [vmem:[%s5224_s4 + $0x3c] ss:$8 sps:$4 sm:$0xff]   ;;  %v3997_v40 = vld [vmem:[%s5224_s4 + $0x4c] ss:$8 sps:$4 sm:$0xff]  }
 0x1a2   :  { %v4500_v46 = vmax.f32 %v973_v38, %v1000_v41  ;;  %1668 = vmatprep.subr.bf16.mxu0 %v3994_v26  ;;  %v3995_v41 = vld [vmem:[%s5224_s4 + $0x48] ss:$8 sps:$4 sm:$0xff]  }
 0x1a3   :  { %v4502_v47 = vmax.f32 %v972_v44, %v998_v43  ;;  %1669 = vmatpush1.bf16.msra.mxu0 %v3992_v25  ;;  %v3998_v43 = vld [vmem:[%s5224_s4 + $0x58] ss:$8 sps:$4 sm:$0xff]   ;;  %v1190_v44 = vld [vmem:[%s5224_s4 + $0x68] sm:$0xff] }
 0x1a4   :  { %1670 = vmatprep.subr.bf16.mxu0 %v3997_v40 }
 0x1a7   :  { %1671 = vmatpush1.bf16.msra.mxu0 %v3995_v41 }
 0x20d   :  { %v757_v48 = vpop.f32.mrb[0].mxu1 }
 0x20e   :  { %v4504_v50 = vmul.f32 0.0006377551, %v757_v48  ;;  %v3698_v57 = vpop.f32.mrb[1].mxu1  ;;  %v3366_v48 = vcombine.high %v1190_v44, %v1190_v44 }
 0x210   :  { %3702 = vmatmul.mubr.msk.f32.vlgmr.msra.gmra.mrb[2].mxu1 %vm762_vm4, %v4504_v50  ;;  %v953_v34 = vsub.f32 0.0, %v4504_v50  ;;  %v3365_v50 = vcombine.low %v1190_v44, %v1190_v44  ;;  %v4036_v44 = vld [vmem:[%s5224_s4 + $0xe0] ss:$8 sps:$4 sm:$0xff]  }
 0x211   :  { %3802 = vmatpush3.bf16.msra.mxu1 %v4367_v32  ;;  %3732 = vmatprep.mubr.msk.f32.mxu1 %vm4175_vm1, %v4176_v51  ;;  %v840_v32 = vlaneseq }
 0x212   :  { %3803 = vmatprep.subr.bf16.mxu1 %v4174_v33  ;;  %v1258_v57 = vsel %vm766_vm3, %v3365_v50, 0  ;;  %v4041_v50 = vld [vmem:[%s5224_s4 + $0xf4] ss:$8 sps:$4 sm:$0xff]  }
 0x215   :  { %3805 = vmatpush3.bf16.msra.mxu1 %v4378_v36  ;;  %v4524_v36 = vshrl.u32 %v840_v32, 7  ;;  %v4005_v32 = vld [vmem:[%s5224_s4 + $0x4] ss:$8 sps:$4 sm:$0xff]  }
 0x216   :  { %3806 = vmatprep.subr.bf16.mxu1 %v4174_v33 }
 0x219   :  { %3808 = vmatpush3.bf16.msra.mxu1 %v4388_v39  ;;  %v4527_v39 = vsub.s32 0, %v4524_v36 }
 0x21a   :  { %3809 = vmatprep.subr.bf16.mxu1 %v4174_v33 }
 0x21d   :  { %3811 = vmatpush3.bf16.msra.mxu1 %v4398_v42 }
 0x21e   :  { %3812 = vmatprep.subr.bf16.mxu1 %v4174_v33 }
 0x221   :  { %3814 = vmatpush3.bf16.msra.mxu1 %v4408_v45 }
 0x222   :  { %3815 = vmatprep.subr.bf16.mxu1 %v4174_v33 }
 0x225   :  { %3817 = vmatpush3.bf16.msra.mxu1 %v4421_v49 }
 0x226   :  { %3818 = vmatprep.subr.bf16.mxu1 %v4174_v33 }
 0x229   :  { %3820 = vmatpush3.bf16.msra.mxu1 %v4429_v52 }
 0x22a   :  { %3735 = vmatprep.subr.mxu1 %v4176_v51 }
 0x2e3   :  { %v836_v42 = vpop.f32.mrb[2].mxu1 }
 0x2e4   :  { %v843_v58 = vrot.slane %v836_v42, %v4527_v39  ;;  %v3703_v45 = vpop.f32.mrb[3].mxu1  ;;  %v4178_v42 = vmov 0  }
 0x2e5   :  { %1700 = vmatprep.mubr.bf16.mxu0 %v4178_v42 }
 0x2e6   :  { %v844_v59 = vsub.f32 %v4436_v54, %v843_v58  ;;  %v845_v49 = vsub.f32 %v4441_v56, %v843_v58  ;;  %v846_v60 = vsub.f32 %v4434_v53, %v843_v58  ;;  %v847_v52 = vsub.f32 %v4439_v55, %v843_v58 }
 0x2e7   :  { %v848_v61 = vsub.f32 %v4455_v0, %v843_v58  ;;  %v849_v62 = vsub.f32 %v4460_v5, %v843_v58  ;;  %v850_v1 = vsub.f32 %v4452_v63, %v843_v58 }
 0x2e8   :  { %v851_v2 = vmul.f32 %v844_v59, %v844_v59  ;;  %v852_v3 = vmul.f32 %v845_v49, %v845_v49  ;;  %v853_v4 = vmul.f32 %v846_v60, %v846_v60  ;;  %v854_v6 = vmul.f32 %v847_v52, %v847_v52 }
 0x2e9   :  { %v855_v56 = vmul.f32 %v848_v61, %v848_v61  ;;  %v856_v55 = vmul.f32 %v849_v62, %v849_v62  ;;  %v857_v5 = vmul.f32 %v850_v1, %v850_v1 }
 0x2ea   :  { %v858_v7 = vsel %vm668_vm2, %v851_v2, 0.0  ;;  %v859_v54 = vsel %vm668_vm2, %v852_v3, 0.0  ;;  %v861_v53 = vsel %vm668_vm2, %v853_v4, 0.0  ;;  %v863_v0 = vsel %vm668_vm2, %v854_v6, 0.0 }
 0x2eb   :  { %v860_v8 = vadd.f32 %v859_v54, %v858_v7  ;;  %v865_v63 = vsel %vm668_vm2, %v855_v56, 0.0  ;;  %v867_v12 = vsel %vm668_vm2, %v856_v55, 0.0  ;;  %v869_v14 = vsel %vm668_vm2, %v857_v5, 0.0  ;;  %v1183_v5 = vld [vmem:[%s5224_s4 + $0x30] sm:$0xff] }
 0x2ed   :  { %v862_v9 = vadd.f32 %v861_v53, %v860_v8 }
 0x2ef   :  { %v864_v10 = vadd.f32 %v863_v0, %v862_v9  ;;  %v4008_v9 = vld [vmem:[%s5224_s4 + $0x14] ss:$8 sps:$4 sm:$0xff]   ;;  %v4006_v0 = vld [vmem:[%s5224_s4 + $0x10] ss:$8 sps:$4 sm:$0xff]  }
 0x2f1   :  { %v866_v11 = vadd.f32 %v865_v63, %v864_v10  ;;  %v4011_v10 = vld [vmem:[%s5224_s4 + $0x24] ss:$8 sps:$4 sm:$0xff]   ;;  %v4009_v63 = vld [vmem:[%s5224_s4 + $0x20] ss:$8 sps:$4 sm:$0xff]  }
 0x2f3   :  { %v868_v13 = vadd.f32 %v867_v12, %v866_v11  ;;  %v3376_v11 = vcombine.high %v1183_v5, %v1183_v5  ;;  %v3375_v12 = vcombine.low %v1183_v5, %v1183_v5  ;;  %v1914_v5 = vld [vmem:[%s5225_s5 + $0x78] sm:$0xff] }
 0x2f5   :  { %v870_v15 = vadd.f32 %v869_v14, %v868_v13  ;;  %v1345_v13 = vsel %vm766_vm3, %v3375_v12, 0  ;;  %v4016_v14 = vld [vmem:[%s5224_s4 + $0x74] ss:$8 sps:$4 sm:$0xff]   ;;  %v1916_v12 = vld [vmem:[%s5225_s5 + $0x88] sm:$0xff] }
 0x2f7   :  { %v871_v17 = vrot.slane %v870_v15, 4 }
 0x2f9   :  { %v872_v18 = vadd.f32 %v871_v17, %v870_v15  ;;  %v4014_v15 = vld [vmem:[%s5224_s4 + $0x70] ss:$8 sps:$4 sm:$0xff]   ;;  %v4019_v17 = vld [vmem:[%s5224_s4 + $0x84] ss:$8 sps:$4 sm:$0xff]  }
 0x2fb   :  { %v873_v20 = vrot.slane %v872_v18, 2 }
 0x2fd   :  { %v874_v21 = vadd.f32 %v873_v20, %v872_v18  ;;  %v4017_v18 = vld [vmem:[%s5224_s4 + $0x80] ss:$8 sps:$4 sm:$0xff]   ;;  %v4022_v20 = vld [vmem:[%s5224_s4 + $0x94] ss:$8 sps:$4 sm:$0xff]  }
 0x2ff   :  { %v875_v22 = vrot.slane %v874_v21, 1 }
 0x301   :  { %v876_v23 = vadd.f32 %v875_v22, %v874_v21  ;;  %v1197_v21 = vld [vmem:[%s5224_s4 + $0xa0] sm:$0xff]  ;;  %v4020_v22 = vld [vmem:[%s5224_s4 + $0x90] ss:$8 sps:$4 sm:$0xff]  }
 0x303   :  { %3733 = vmatmul.mubr.msk.f32.vlgmr.msra.gmra.mrb[4].mxu1 %vm668_vm2, %v876_v23  ;;  %v3386_v23 = vcombine.high %v1197_v21, %v1197_v21 }
 0x304   :  { %3736 = vmatpush3.msk.msra.mxu1 %vm766_vm3, %v4475_v16  ;;  %3737 = vmatprep.mubr.msk.f32.mxu1 %vm4175_vm1, %v4176_v51 }
 0x305   :  { %3740 = vmatprep.subr.mxu1 %v4176_v51 }
 0x3d6   :  { %v946_v27 = vpop.f32.mrb[4].mxu1 }
 0x3d7   :  { %v950_v28 = vmul.f32 0.0006377551, %v946_v27  ;;  %v3734_v30 = vpop.f32.mrb[5].mxu1  ;;  %v4027_v27 = vld [vmem:[%s5224_s4 + $0xac] ss:$8 sps:$4 sm:$0xff]  }
 0x3d8   :  { %v4030_v30 = vld [vmem:[%s5224_s4 + $0xbc] ss:$8 sps:$4 sm:$0xff]  }
 0x3d9   :  { %v951_v31 = vadd.f32 1e-05, %v950_v28  ;;  %v4025_v28 = vld [vmem:[%s5224_s4 + $0xa8] ss:$8 sps:$4 sm:$0xff]  }
 0x3db   :  { %4146 = vrsqrt.f32 %v951_v31  ;;  %v4028_v31 = vld [vmem:[%s5224_s4 + $0xb8] ss:$8 sps:$4 sm:$0xff]  }
 0x3e5   :  { %v4147_v37 = vpop.eup %4146 }
 0x3e6   :  { %3738 = vmatmul.mubr.msk.f32.vlgmr.msra.gmra.mrb[6].mxu1 %vm762_vm4, %v4147_v37  ;;  %v954_v38 = vmul.f32 %v4147_v37, %v953_v34  ;;  %v4033_v34 = vld [vmem:[%s5224_s4 + $0xcc] ss:$8 sps:$4 sm:$0xff]   ;;  %v1204_v37 = vld [vmem:[%s5224_s4 + $0xd8] sm:$0xff] }
 0x3e7   :  { %3741 = vmatpush3.msk.msra.mxu1 %vm766_vm3, %v4475_v16  ;;  %3742 = vmatprep.mubr.msk.f32.mxu1 %vm4175_vm1, %v4176_v51  ;;  %v4000_v16 = vld [vmem:[%s5224_s4 + $0x5c] ss:$8 sps:$4 sm:$0xff]  }
 0x3e8   :  { %1263 = vmatprep.subr.bf16.mxu1 %v3994_v26  ;;  %1672 = vmatprep.subr.bf16.mxu0 %v4000_v16 }
 0x3e9   :  { %1673 = vmatpush1.bf16.msra.mxu0 %v3998_v43 }
 0x3ea   :  { %3743 = vmatmul.mubr.msk.f32.vlgmr.msra.gmra.mrb[8].mxu1 %vm762_vm4, %v954_v38  ;;  %3409 = vmatprep.subr.msk.bf16.mxu0 %vm766_vm3, %v3366_v48  ;;  %v4031_v38 = vld [vmem:[%s5224_s4 + $0xc8] ss:$8 sps:$4 sm:$0xff]  }
 0x3eb   :  { %1264 = vmatpush1.bf16.msra.mxu1 %v3992_v25  ;;  %1295 = vmatprep.mubr.bf16.mxu1 %v4178_v42  ;;  %v3385_v25 = vcombine.low %v1197_v21, %v1197_v21 }
 0x3ec   :  { %1265 = vmatprep.subr.bf16.mxu1 %v3997_v40  ;;  %v3396_v40 = vcombine.high %v1204_v37, %v1204_v37 }
 0x3ed   :  { %1675 = vmatpush1.bf16.msra.mxu0 %v1258_v57  ;;  %v1433_v26 = vsel %vm766_vm3, %v3385_v25, 0  ;;  %v1920_v25 = vld [vmem:[%s5226_s6 + $0x8] sm:$0xff] }
 0x3ee   :  { %1711 = vmatprep.subr.bf16.mxu0 %v4005_v32 }
 0x3ef   :  { %1266 = vmatpush1.bf16.msra.mxu1 %v3995_v41  ;;  %v3395_v41 = vcombine.low %v1204_v37, %v1204_v37 }
 0x3f0   :  { %1267 = vmatprep.subr.bf16.mxu1 %v4000_v16 }
 0x3f1   :  { %v1524_v16 = vsel %vm766_vm3, %v3395_v41, 0 }
 0x3f3   :  { %1268 = vmatpush1.bf16.msra.mxu1 %v3998_v43  ;;  %v4038_v43 = vld [vmem:[%s5224_s4 + $0xe4] ss:$8 sps:$4 sm:$0xff]  }
 0x3f4   :  { %3367 = vmatprep.subr.msk.bf16.mxu1 %vm766_vm3, %v3366_v48 }
 0x3f7   :  { %1270 = vmatpush1.bf16.msra.mxu1 %v1258_v57  ;;  %v4039_v57 = vld [vmem:[%s5224_s4 + $0xf0] ss:$8 sps:$4 sm:$0xff]  }
 0x3f8   :  { %1350 = vmatprep.subr.bf16.mxu1 %v4005_v32  ;;  %v4044_v32 = vld [vmem:[%s5224_s4 + $0x104] ss:$8 sps:$4 sm:$0xff]  }
 0x4b9   :  { %v1078_v58 = vpop.f32.mrb[6].mxu1 }
 0x4ba   :  { %v1158_v45 = vrot.slane %v1078_v58, %v4527_v39  ;;  %v3739_v59 = vpop.f32.mrb[7].mxu1  ;;  %v1211_v58 = vld [vmem:[%s5224_s4 + $0x110] sm:$0xff] }
 0x4bb   :  { %v3406_v59 = vcombine.high %v1211_v58, %v1211_v58 }
 0x4bc   :  { %v1159_v49 = vmul.f32 %v1158_v45, %v4493_v35  ;;  %v1160_v60 = vmul.f32 %v1158_v45, %v4502_v47  ;;  %v1161_v52 = vmul.f32 %v1158_v45, %v4500_v46  ;;  %v1162_v61 = vmul.f32 %v1158_v45, %v1008_v29  ;;  %v4042_v45 = vld [vmem:[%s5224_s4 + $0x100] ss:$8 sps:$4 sm:$0xff]  }
 0x4bd   :  { %v1151_v62 = vpop.f32.mrb[8].mxu1 }
 0x4be   :  { %v1166_v1 = vrot.slane %v1151_v62, %v4527_v39  ;;  %v3744_v2 = vpop.f32.mrb[9].mxu1 }
 0x4bf   :  { %v1901_v2 = vld [vmem:[%s5225_s5 + $0x10] sm:$0xff] }
 0x4c0   :  { %v1167_v3 = vadd.f32 %v1166_v1, %v1159_v49  ;;  %v1168_v4 = vadd.f32 %v1166_v1, %v1160_v60  ;;  %v1169_v6 = vadd.f32 %v1166_v1, %v1161_v52  ;;  %v1170_v7 = vadd.f32 %v1166_v1, %v1162_v61  ;;  %v1899_v52 = vld [vmem:[%s5225_s5] sm:$0xff]  ;;  %v1900_v61 = vld [vmem:[%s5225_s5 + $0x8] sm:$0xff] }
 0x4c1   :  { %v3405_v49 = vcombine.low %v1211_v58, %v1211_v58  ;;  %v4725_v1 = vpack.c.bf16 %v1900_v61, %v1899_v52 }
 0x4c2   :  { %v1171_v54 = vmax.f32 %v1167_v3, 0.0  ;;  %v1172_v8 = vmax.f32 %v1168_v4, 0.0  ;;  %v1173_v56 = vmax.f32 %v1169_v6, 0.0  ;;  %v1174_v35 = vmax.f32 %v1170_v7, 0.0  ;;  %v1902_v3 = vld [vmem:[%s5225_s5 + $0x18] sm:$0xff]  ;;  %v1903_v6 = vld [vmem:[%s5225_s5 + $0x20] sm:$0xff] }
 0x4c3   :  { %v1616_v60 = vsel %vm766_vm3, %v3405_v49, 0  ;;  %v4738_v4 = vpack.c.bf16 %v1902_v3, %v1901_v2  ;;  %v1904_v7 = vld [vmem:[%s5225_s5 + $0x28] sm:$0xff] }
 0x4c4   :  { %v4594_v53 = vpack.c.bf16 %v1172_v8, %v1171_v54  ;;  %v4596_v47 = vpack.c.bf16 %v1174_v35, %v1173_v56  ;;  %v4748_v54 = vpack.c.bf16 %v1904_v7, %v1903_v6  ;;  %v1905_v8 = vld [vmem:[%s5225_s5 + $0x30] sm:$0xff]  ;;  %v1906_v56 = vld [vmem:[%s5225_s5 + $0x38] sm:$0xff] }
 0x4c5   :  { %v4758_v35 = vpack.c.bf16 %v1906_v56, %v1905_v8 }
 0x4c6   :  { %v1393_v24 = vrot.slane %v4594_v53, 1  ;;  %v1215_v29 = vrot.slane %v4594_v53, 7  ;;  %v1216_v46 = vrot.slane %v4596_v47, 7  ;;  %v1576_v48 = vrot.slane %v4594_v53, 2 }
 0x4c7   :  { %v1848_v62 = vrot.slane %v4596_v47, 1 }
 0x4c8   :  { %3410 = vmatmul.mubr.msk.bf16.vlgmr.msra.gmra.mrb[8].mxu0 %vm1253_vm5, %v1393_v24  ;;  %v1217_v55 = vsel %vm1214_vm6, %v1215_v29, %v1216_v46  ;;  %v1910_v29 = vld [vmem:[%s5225_s5 + $0x58] sm:$0xff] }
 0x4c9   :  { %1712 = vmatpush1.bf16.msra.mxu0 %v4003_v19  ;;  %3368 = vmatmul.mubr.msk.bf16.vlgmr.msra.gmra.mrb[12].mxu1 %vm1253_vm5, %v1217_v55 }
 0x4ca   :  { %1351 = vmatpush1.bf16.msra.mxu1 %v4003_v19  ;;  %1713 = vmatprep.subr.bf16.mxu0 %v4008_v9 }
 0x4cb   :  { %1352 = vmatprep.subr.bf16.mxu1 %v4008_v9  ;;  %1743 = vmatprep.mubr.bf16.mxu0 %v4178_v42  ;;  %v1911_v9 = vld [vmem:[%s5225_s5 + $0x60] sm:$0xff] }
 0x4cc   :  { %1382 = vmatprep.mubr.bf16.mxu1 %v4178_v42 }
 0x4cd   :  { %1714 = vmatpush1.bf16.msra.mxu0 %v4006_v0 }
 0x4ce   :  { %1353 = vmatpush1.bf16.msra.mxu1 %v4006_v0  ;;  %1715 = vmatprep.subr.bf16.mxu0 %v4011_v10 }
 0x4cf   :  { %1354 = vmatprep.subr.bf16.mxu1 %v4011_v10  ;;  %v1913_v10 = vld [vmem:[%s5225_s5 + $0x70] sm:$0xff] }
 0x4d1   :  { %1716 = vmatpush1.bf16.msra.mxu0 %v4009_v63 }
 0x4d2   :  { %1355 = vmatpush1.bf16.msra.mxu1 %v4009_v63  ;;  %3411 = vmatprep.subr.msk.bf16.mxu0 %vm766_vm3, %v3376_v11  ;;  %v4799_v63 = vpack.c.bf16 %v1914_v5, %v1913_v10 }
 0x4d3   :  { %3377 = vmatprep.subr.msk.bf16.mxu1 %vm766_vm3, %v3376_v11  ;;  %v1915_v11 = vld [vmem:[%s5225_s5 + $0x80] sm:$0xff] }
 0x4d5   :  { %1718 = vmatpush1.bf16.msra.mxu0 %v1345_v13 }
 0x4d6   :  { %1357 = vmatpush1.bf16.msra.mxu1 %v1345_v13  ;;  %1754 = vmatprep.subr.bf16.mxu0 %v4016_v14  ;;  %v4809_v13 = vpack.c.bf16 %v1916_v12, %v1915_v11 }
 0x4d7   :  { %1438 = vmatprep.subr.bf16.mxu1 %v4016_v14  ;;  %v1917_v14 = vld [vmem:[%s5225_s5 + $0x90] sm:$0xff] }
 0x4d8   :  { %3412 = vmatmul.mubr.msk.bf16.vlgmr.msra.gmra.mrb[8].mxu0 %vm1253_vm5, %v1217_v55  ;;  %v1912_v55 = vld [vmem:[%s5225_s5 + $0x68] sm:$0xff] }
 0x4d9   :  { %3378 = vmatmul.mubr.msk.bf16.vlgmr.msra.gmra.mrb[12].mxu1 %vm1253_vm5, %v4594_v53  ;;  %1755 = vmatpush1.bf16.msra.mxu0 %v4014_v15  ;;  %v1907_v53 = vld [vmem:[%s5225_s5 + $0x40] sm:$0xff]  ;;  %v4789_v0 = vpack.c.bf16 %v1912_v55, %v1911_v9 }
 0x4da   :  { %1439 = vmatpush1.bf16.msra.mxu1 %v4014_v15  ;;  %1756 = vmatprep.subr.bf16.mxu0 %v4019_v17  ;;  %v1918_v15 = vld [vmem:[%s5225_s5 + $0x98] sm:$0xff] }
 0x4db   :  { %1440 = vmatprep.subr.bf16.mxu1 %v4019_v17  ;;  %1786 = vmatprep.mubr.bf16.mxu0 %v4178_v42  ;;  %v4819_v17 = vpack.c.bf16 %v1918_v15, %v1917_v14 }
 0x4dc   :  { %1470 = vmatprep.mubr.bf16.mxu1 %v4178_v42 }
 0x4dd   :  { %1757 = vmatpush1.bf16.msra.mxu0 %v4017_v18 }
 0x4de   :  { %1441 = vmatpush1.bf16.msra.mxu1 %v4017_v18  ;;  %1758 = vmatprep.subr.bf16.mxu0 %v4022_v20 }
 0x4df   :  { %1442 = vmatprep.subr.bf16.mxu1 %v4022_v20 }
 0x4e1   :  { %1759 = vmatpush1.bf16.msra.mxu0 %v4020_v22 }
 0x4e2   :  { %1443 = vmatpush1.bf16.msra.mxu1 %v4020_v22  ;;  %3413 = vmatprep.subr.msk.bf16.mxu0 %vm766_vm3, %v3386_v23 }
 0x4e3   :  { %3387 = vmatprep.subr.msk.bf16.mxu1 %vm766_vm3, %v3386_v23 }
 0x4e5   :  { %1761 = vmatpush1.bf16.msra.mxu0 %v1433_v26 }
 0x4e6   :  { %1445 = vmatpush1.bf16.msra.mxu1 %v1433_v26  ;;  %1801 = vmatprep.subr.bf16.mxu0 %v4027_v27  ;;  %v1922_v26 = vld [vmem:[%s5226_s6 + $0x18] sm:$0xff] }
 0x4e7   :  { %1529 = vmatprep.subr.bf16.mxu1 %v4027_v27  ;;  %v1919_v27 = vld [vmem:[%s5226_s6] sm:$0xff]  ;;  %v3851_v37 = vpack.c.bf16 %v1922_v26, %v1920_v25 }
 0x4e8   :  { %3414 = vmatmul.mubr.msk.bf16.vlgmr.msra.gmra.mrb[8].mxu0 %vm1253_vm5, %v4596_v47 }
 0x4e9   :  { %3388 = vmatmul.mubr.msk.bf16.vlgmr.msra.gmra.mrb[12].mxu1 %vm1253_vm5, %v1393_v24  ;;  %1802 = vmatpush1.bf16.msra.mxu0 %v4025_v28  ;;  %v1909_v24 = vld [vmem:[%s5225_s5 + $0x50] sm:$0xff] }
 0x4ea   :  { %1530 = vmatpush1.bf16.msra.mxu1 %v4025_v28  ;;  %1803 = vmatprep.subr.bf16.mxu0 %v4030_v30  ;;  %v4779_v46 = vpack.c.bf16 %v1910_v29, %v1909_v24 }
 0x4eb   :  { %1531 = vmatprep.subr.bf16.mxu1 %v4030_v30  ;;  %1833 = vmatprep.mubr.bf16.mxu0 %v4178_v42 }
 0x4ec   :  { %1561 = vmatprep.mubr.bf16.mxu1 %v4178_v42 }
 0x4ed   :  { %1804 = vmatpush1.bf16.msra.mxu0 %v4028_v31 }
 0x4ee   :  { %1532 = vmatpush1.bf16.msra.mxu1 %v4028_v31  ;;  %1805 = vmatprep.subr.bf16.mxu0 %v4033_v34 }
 0x4ef   :  { %1533 = vmatprep.subr.bf16.mxu1 %v4033_v34 }
 0x4f1   :  { %1806 = vmatpush1.bf16.msra.mxu0 %v4031_v38 }
 0x4f2   :  { %1534 = vmatpush1.bf16.msra.mxu1 %v4031_v38  ;;  %3415 = vmatprep.subr.msk.bf16.mxu0 %vm766_vm3, %v3396_v40  ;;  %v1921_v38 = vld [vmem:[%s5226_s6 + $0x10] sm:$0xff] }
 0x4f3   :  { %3397 = vmatprep.subr.msk.bf16.mxu1 %vm766_vm3, %v3396_v40 }
 0x4f5   :  { %1808 = vmatpush1.bf16.msra.mxu0 %v1524_v16 }
 0x4f6   :  { %1536 = vmatpush1.bf16.msra.mxu1 %v1524_v16  ;;  %1852 = vmatprep.subr.bf16.mxu0 %v4038_v43 }
 0x4f7   :  { %1621 = vmatprep.subr.bf16.mxu1 %v4038_v43 }
 0x4f8   :  { %3416 = vmatmul.mubr.msk.bf16.vlgmr.msra.gmra.mrb[8].mxu0 %vm1253_vm5, %v1576_v48 }
 0x4f9   :  { %3398 = vmatmul.mubr.msk.bf16.vlgmr.msra.gmra.mrb[12].mxu1 %vm1253_vm5, %v4596_v47  ;;  %1853 = vmatpush1.bf16.msra.mxu0 %v4036_v44  ;;  %v1908_v47 = vld [vmem:[%s5225_s5 + $0x48] sm:$0xff] }
 0x4fa   :  { %1622 = vmatpush1.bf16.msra.mxu1 %v4036_v44  ;;  %1854 = vmatprep.subr.bf16.mxu0 %v4041_v50  ;;  %v4769_v19 = vpack.c.bf16 %v1908_v47, %v1907_v53  ;;  %v4863_v44 = vpack.c.bf16 %v1921_v38, %v1919_v27 }
 0x4fb   :  { %1623 = vmatprep.subr.bf16.mxu1 %v4041_v50  ;;  %1884 = vmatprep.mubr.bf16.mxu0 %v4178_v42 }
 0x4fc   :  { %1653 = vmatprep.mubr.bf16.mxu1 %v4178_v42 }
 0x4fd   :  { %1855 = vmatpush1.bf16.msra.mxu0 %v4039_v57 }
 0x4fe   :  { %1624 = vmatpush1.bf16.msra.mxu1 %v4039_v57  ;;  %1856 = vmatprep.subr.bf16.mxu0 %v4044_v32 }
 0x4ff   :  { %1625 = vmatprep.subr.bf16.mxu1 %v4044_v32 }
 0x501   :  { %1857 = vmatpush1.bf16.msra.mxu0 %v4042_v45 }
 0x502   :  { %1626 = vmatpush1.bf16.msra.mxu1 %v4042_v45  ;;  %3417 = vmatprep.subr.msk.bf16.mxu0 %vm766_vm3, %v3406_v59 }
 0x503   :  { %3407 = vmatprep.subr.msk.bf16.mxu1 %vm766_vm3, %v3406_v59 }
 0x505   :  { %1859 = vmatpush1.bf16.msra.mxu0 %v1616_v60 }
 0x506   :  { %1628 = vmatpush1.bf16.msra.mxu1 %v1616_v60  ;;  %3852 = vmatprep.subr.bf16.mxu0 %v3851_v37 }
 0x507   :  { %3821 = vmatprep.subr.bf16.mxu1 %v4174_v33 }
 0x508   :  { %3418 = vmatmul.mubr.msk.bf16.vlgmr.msra.gmra.mrb[8].mxu0 %vm1253_vm5, %v1848_v62 }
 0x509   :  { %3408 = vmatmul.mubr.msk.bf16.vlgmr.msra.gmra.mrb[12].mxu1 %vm1253_vm5, %v1576_v48  ;;  %2103 = vmatprep.mubr.f32.mxu0 %v4176_v51 }
 0x50a   :  { %3823 = vmatpush1.bf16.msra.mxu1 %v4725_v1  ;;  %3854 = vmatpush1.bf16.msra.mxu0 %v4863_v44 }
 0x50b   :  { %3824 = vmatprep.subr.bf16.mxu1 %v4174_v33  ;;  %3855 = vmatprep.subr.bf16.mxu0 %v4174_v33 }
 0x50e   :  { %3826 = vmatpush1.bf16.msra.mxu1 %v4738_v4 }
 0x50f   :  { %3827 = vmatprep.subr.bf16.mxu1 %v4174_v33 }
 0x512   :  { %3829 = vmatpush1.bf16.msra.mxu1 %v4748_v54 }
 0x513   :  { %3830 = vmatprep.subr.bf16.mxu1 %v4174_v33 }
 0x516   :  { %3832 = vmatpush1.bf16.msra.mxu1 %v4758_v35 }
 0x517   :  { %3833 = vmatprep.subr.bf16.mxu1 %v4174_v33 }
 0x51a   :  { %3835 = vmatpush1.bf16.msra.mxu1 %v4769_v19 }
 0x51b   :  { %3836 = vmatprep.subr.bf16.mxu1 %v4174_v33 }
 0x51e   :  { %3838 = vmatpush1.bf16.msra.mxu1 %v4779_v46 }
 0x51f   :  { %3839 = vmatprep.subr.bf16.mxu1 %v4174_v33 }
 0x522   :  { %3841 = vmatpush1.bf16.msra.mxu1 %v4789_v0 }
 0x523   :  { %3842 = vmatprep.subr.bf16.mxu1 %v4174_v33 }
 0x526   :  { %3844 = vmatpush1.bf16.msra.mxu1 %v4799_v63 }
 0x527   :  { %3845 = vmatprep.subr.bf16.mxu1 %v4174_v33 }
 0x52a   :  { %3847 = vmatpush1.bf16.msra.mxu1 %v4809_v13 }
 0x52b   :  { %3848 = vmatprep.subr.bf16.mxu1 %v4174_v33 }
 0x52e   :  { %3850 = vmatpush1.bf16.msra.mxu1 %v4819_v17 }
 0x5db   :  { %v4822_v18 = vpop.f32.mrb[8].mxu0 }
 0x5dc   :  { %2271 = vrot.lane.b32.xlu1 %v4822_v18, %s4179_s1  ;;  %v4826_v20 = vpop.f32.mrb[12].mxu1  ;;  %v4828_v21 = vpop.f32.mrb[9].mxu0 }
 0x5dd   :  { %2273 = vrot.lane.b32.xlu0 %v4828_v21, %s4179_s1  ;;  %v4832_v22 = vpop.f32.mrb[13].mxu1  ;;  %v4834_v23 = vpop.f32.mrb[10].mxu0  ;;  %v1950_v28 = vsel %vm131_vm0, %v4828_v21, 0.0 }
 0x5de   :  { %v1942_v30 = vsel %vm1923_vm7, %v4834_v23, 0.0  ;;  %v4849_v31 = vpop.f32.mrb[14].mxu1  ;;  %v4851_v34 = vpop.f32.mrb[11].mxu0  ;;  %v1932_v48 = vsel %vm131_vm0, %v4832_v22, 0.0 }
 0x5df   :  { %v1943_v40 = vadd.f32 %v1942_v30, %v4822_v18  ;;  %v1924_v41 = vsel %vm1923_vm7, %v4849_v31, 0.0  ;;  %v1951_v16 = vsel %vm1933_vm8, %v4851_v34, 0.0  ;;  %v4861_v43 = vpop.f32.mrb[15].mxu1 }
 0x5e0   :  { %v1925_v50 = vadd.f32 %v1924_v41, %v4826_v20  ;;  %v1952_v57 = vadd.f32 %v1951_v16, %v1950_v28  ;;  %v1934_v32 = vsel %vm1933_vm8, %v4861_v43, 0.0  ;;  %2252 = vrot.lane.b32.xlu1 %v4826_v20, %s4179_s1 }
 0x5e1   :  { %v1944_v58 = vrot.slane %v1943_v40, 4  ;;  %v1935_v45 = vadd.f32 %v1934_v32, %v1932_v48  ;;  %2254 = vrot.lane.b32.xlu0 %v4832_v22, %s4179_s1 }
 0x5e2   :  { %v1926_v59 = vrot.slane %v1925_v50, 4  ;;  %v1953_v49 = vrot.slane %v1952_v57, 4 }
 0x5e3   :  { %v1945_v60 = vadd.f32 %v1944_v58, %v1943_v40  ;;  %v1936_v52 = vrot.slane %v1935_v45, 4 }
 0x5e4   :  { %v1927_v61 = vadd.f32 %v1926_v59, %v1925_v50  ;;  %v1954_v62 = vadd.f32 %v1953_v49, %v1952_v57  ;;  %2256 = vrot.lane.b32.xlu1 %v4849_v31, %s4179_s1 }
 0x5e5   :  { %v1946_v2 = vrot.slane %v1945_v60, 2  ;;  %v1937_v3 = vadd.f32 %v1936_v52, %v1935_v45  ;;  %2258 = vrot.lane.b32.xlu0 %v4861_v43, %s4179_s1 }
 0x5e6   :  { %v1928_v6 = vrot.slane %v1927_v61, 2  ;;  %v1955_v7 = vrot.slane %v1954_v62, 2 }
 0x5e7   :  { %v1947_v8 = vadd.f32 %v1946_v2, %v1945_v60  ;;  %v1938_v56 = vrot.slane %v1937_v3, 2 }
 0x5e8   :  { %v1929_v53 = vadd.f32 %v1928_v6, %v1927_v61  ;;  %v1956_v47 = vadd.f32 %v1955_v7, %v1954_v62  ;;  %2275 = vrot.lane.b32.xlu1 %v4834_v23, %s4179_s1 }
 0x5e9   :  { %v1939_v24 = vadd.f32 %v1938_v56, %v1937_v3  ;;  %2277 = vrot.lane.b32.xlu0 %v4851_v34, %s4179_s1  ;;  %v1948_v29 = vrot.slane %v1947_v8, 1 }
 0x5ea   :  { %v1957_v9 = vrot.slane %v1956_v47, 1  ;;  %v1930_v55 = vrot.slane %v1929_v53, 1 }
 0x5eb   :  { %v1940_v10 = vrot.slane %v1939_v24, 1  ;;  %v1949_v5 = vadd.f32 %v1948_v29, %v1947_v8 }
 0x5ec   :  { %v1958_v11 = vadd.f32 %v1957_v9, %v1956_v47  ;;  %v1931_v12 = vadd.f32 %v1930_v55, %v1929_v53 }
 0x5ed   :  { %v1941_v14 = vadd.f32 %v1940_v10, %v1939_v24 }
 0x5ee   :  { %v1959_v15 = vadd.f32 %v1949_v5, %v1931_v12 }
 0x5ef   :  { %v1960_v25 = vadd.f32 %v1958_v11, %v1941_v14 }
 0x5f1   :  { %3419 = vmatprep.mubr.msk.f32.mxu1 %vm131_vm0, %v1960_v25 }
 0x5f2   :  { %2029 = vmatmul.mubr.f32.vlgmr.msra.gmra.mrb[10].mxu1 %v1959_v15 }
 0x5f3   :  { %2586 = vmatprep.mubr.bf16.mxu1 %v4178_v42 }
 0x64e   :  { %v2272_v26 = vpop.permute.xlu1 %2271 }
 0x64f   :  { %v2274_v27 = vpop.permute.xlu0 %2273 }
 0x650   :  { %v2279_v28 = vsel %vm2260_vm9, %v2272_v26, %v2274_v27 }
 0x651   :  { %v2283_v40 = vmax.f32 %v4822_v18, %v2279_v28 }
 0x652   :  { %v2253_v30 = vpop.permute.xlu1 %2252 }
 0x653   :  { %v2255_v37 = vpop.permute.xlu0 %2254 }
 0x654   :  { %v2261_v38 = vsel %vm2260_vm9, %v2253_v30, %v2255_v37 }
 0x655   :  { %v2265_v41 = vmax.f32 %v4826_v20, %v2261_v38 }
 0x656   :  { %v2257_v16 = vpop.permute.xlu1 %2256 }
 0x657   :  { %v2259_v48 = vpop.permute.xlu0 %2258  ;;  %v4888_v50 = vmax.f32 %v2265_v41, %v2283_v40 }
 0x658   :  { %v2262_v57 = vsel %vm2260_vm9, %v2257_v16, %v2259_v48 }
 0x659   :  { %v2266_v59 = vmax.f32 %v4849_v31, %v2262_v57 }
 0x65a   :  { %v2276_v32 = vpop.permute.xlu1 %2275 }
 0x65b   :  { %v2278_v58 = vpop.permute.xlu0 %2277 }
 0x65c   :  { %v2280_v45 = vsel %vm2260_vm9, %v2276_v32, %v2278_v58 }
 0x65d   :  { %v2284_v49 = vmax.f32 %v4834_v23, %v2280_v45 }
 0x65f   :  { %v4892_v60 = vmax.f32 %v2266_v59, %v2284_v49 }
 0x6c5   :  { %v2030_v52 = vpop.f32.mrb[10].mxu1 }
 0x6c6   :  { %v4894_v61 = vmul.f32 0.005, %v2030_v52  ;;  %v2032_v62 = vpop.f32.mrb[11].mxu1 }
 0x6c8   :  { %3420 = vmatmul.mubr.msk.f32.vlgmr.msra.gmra.mrb[12].mxu0 %vm2035_vm10, %v4894_v61 }
 0x6c9   :  { %3857 = vmatpush1.bf16.msra.mxu0 %v4725_v1 }
 0x6ca   :  { %3858 = vmatprep.subr.bf16.mxu0 %v4174_v33 }
 0x6cd   :  { %3860 = vmatpush1.bf16.msra.mxu0 %v4738_v4 }
 0x6ce   :  { %3861 = vmatprep.subr.bf16.mxu0 %v4174_v33 }
 0x6d1   :  { %3863 = vmatpush1.bf16.msra.mxu0 %v4748_v54 }
 0x6d2   :  { %3864 = vmatprep.subr.bf16.mxu0 %v4174_v33 }
 0x6d5   :  { %3866 = vmatpush1.bf16.msra.mxu0 %v4758_v35 }
 0x6d6   :  { %3867 = vmatprep.subr.bf16.mxu0 %v4174_v33 }
 0x6d9   :  { %3869 = vmatpush1.bf16.msra.mxu0 %v4769_v19 }
 0x6da   :  { %3870 = vmatprep.subr.bf16.mxu0 %v4174_v33 }
 0x6dd   :  { %3872 = vmatpush1.bf16.msra.mxu0 %v4779_v46 }
 0x6de   :  { %3873 = vmatprep.subr.bf16.mxu0 %v4174_v33 }
 0x6e1   :  { %3875 = vmatpush1.bf16.msra.mxu0 %v4789_v0 }
 0x6e2   :  { %3876 = vmatprep.subr.bf16.mxu0 %v4174_v33 }
 0x6e5   :  { %3878 = vmatpush1.bf16.msra.mxu0 %v4799_v63 }
 0x6e6   :  { %3879 = vmatprep.subr.bf16.mxu0 %v4174_v33 }
 0x6e9   :  { %3881 = vmatpush1.bf16.msra.mxu0 %v4809_v13 }
 0x6ea   :  { %3882 = vmatprep.subr.bf16.mxu0 %v4174_v33 }
 0x6ed   :  { %3884 = vmatpush1.bf16.msra.mxu0 %v4819_v17 }
 0x6ee   :  { %3885 = vmatprep.subr.bf16.mxu0 %v4174_v33 }
 0x79b   :  { %v2105_v1 = vpop.f32.mrb[12].mxu0 }
 0x79c   :  { %v2113_v4 = vrot.slane %v2105_v1, %v4527_v39  ;;  %v2107_v54 = vpop.f32.mrb[13].mxu0 }
 0x79d   :  { %v2117_v35 = vrot.slane %v2107_v54, %v4527_v39  ;;  %v4052_v54 = vld [vmem:[%s5227_s7 + $0x54] ss:$8 sps:$4 sm:$0xff]  }
 0x79e   :  { %v2118_v19 = vsub.f32 %v4826_v20, %v2113_v4  ;;  %v2120_v46 = vsub.f32 %v4849_v31, %v2113_v4  ;;  %v2122_v0 = vsub.f32 %v4822_v18, %v2113_v4  ;;  %v2124_v63 = vsub.f32 %v4834_v23, %v2113_v4  ;;  %v4050_v4 = vld [vmem:[%s5227_s7 + $0x50] ss:$8 sps:$4 sm:$0xff]   ;;  %2554 = vmatprep.subr.bf16.mxu1 %v4052_v54  ;;  %v4109_v54 = vld [vmem:[%s5227_s7 + $0x144] ss:$8 sps:$4 sm:$0xff]  }
 0x79f   :  { %v2119_v13 = vsub.f32 %v4832_v22, %v2117_v35  ;;  %v2121_v17 = vsub.f32 %v4861_v43, %v2117_v35  ;;  %v2123_v2 = vsub.f32 %v4828_v21, %v2117_v35  ;;  %v2125_v3 = vsub.f32 %v4851_v34, %v2117_v35  ;;  %2555 = vmatpush1.bf16.msra.mxu1 %v4050_v4  ;;  %v4056_v35 = vld [vmem:[%s5227_s7 + $0x60] ss:$8 sps:$4 sm:$0xff]  }
 0x7a0   :  { %v2126_v6 = vmul.f32 %v2118_v19, %v2118_v19  ;;  %v2128_v7 = vmul.f32 %v2120_v46, %v2120_v46  ;;  %v2147_v8 = vmul.f32 %v2122_v0, %v2122_v0  ;;  %v2149_v56 = vmul.f32 %v2124_v63, %v2124_v63  ;;  %v4058_v19 = vld [vmem:[%s5227_s7 + $0x64] ss:$8 sps:$4 sm:$0xff]   ;;  %v4104_v4 = vld [vmem:[%s5227_s7 + $0xe0] ss:$8 sps:$4 sm:$0xff]  }
 0x7a1   :  { %v2127_v53 = vmul.f32 %v2119_v13, %v2119_v13  ;;  %v2129_v20 = vmul.f32 %v2121_v17, %v2121_v17  ;;  %v2148_v47 = vmul.f32 %v2123_v2, %v2123_v2  ;;  %v2150_v31 = vmul.f32 %v2125_v3, %v2125_v3  ;;  %2556 = vmatprep.subr.bf16.mxu1 %v4058_v19  ;;  %v4049_v17 = vld [vmem:[%s5227_s7 + $0x4] ss:$8 sps:$4 sm:$0xff]   ;;  %v4107_v19 = vld [vmem:[%s5227_s7 + $0x140] ss:$8 sps:$4 sm:$0xff]  }
 0x7a2   :  { %v2130_v18 = vsel %vm1923_vm7, %v2128_v7, 0.0  ;;  %v2151_v23 = vsel %vm1923_vm7, %v2149_v56, 0.0  ;;  %v2246_v13 = vsub.f32 0.0, %v4894_v61  ;;  %v4055_v61 = vld [vmem:[%s5227_s7 + $0x14] ss:$8 sps:$4 sm:$0xff]  }
 0x7a3   :  { %v2131_v24 = vadd.f32 %v2130_v18, %v2126_v6  ;;  %v2152_v22 = vadd.f32 %v2151_v23, %v2147_v8  ;;  %v2138_v43 = vsel %vm131_vm0, %v2127_v53, 0.0  ;;  %v2139_v21 = vsel %vm1933_vm8, %v2129_v20, 0.0  ;;  %2557 = vmatpush1.bf16.msra.mxu1 %v4056_v35  ;;  %v4047_v6 = vld [vmem:[%s5227_s7] ss:$8 sps:$4 sm:$0xff]   ;;  %v4053_v7 = vld [vmem:[%s5227_s7 + $0x10] ss:$8 sps:$4 sm:$0xff]  }
 0x7a4   :  { %v2140_v29 = vadd.f32 %v2139_v21, %v2138_v43  ;;  %v2159_v34 = vsel %vm131_vm0, %v2148_v47, 0.0  ;;  %v2160_v9 = vsel %vm1933_vm8, %v2150_v31, 0.0  ;;  %v4059_v8 = vld [vmem:[%s5227_s7 + $0x20] ss:$8 sps:$4 sm:$0xff]   ;;  %v4064_v56 = vld [vmem:[%s5227_s7 + $0x74] ss:$8 sps:$4 sm:$0xff]  }
 0x7a5   :  { %v2132_v55 = vrot.slane %v2131_v24, 4  ;;  %v2153_v10 = vrot.slane %v2152_v22, 4  ;;  %v2161_v5 = vadd.f32 %v2160_v9, %v2159_v34  ;;  %v4062_v53 = vld [vmem:[%s5227_s7 + $0x70] ss:$8 sps:$4 sm:$0xff]   ;;  %2558 = vmatprep.subr.bf16.mxu1 %v4064_v56  ;;  %v4067_v20 = vld [vmem:[%s5227_s7 + $0x34] ss:$8 sps:$4 sm:$0xff]  }
 0x7a6   :  { %v2141_v11 = vrot.slane %v2140_v29, 4  ;;  %v4065_v47 = vld [vmem:[%s5227_s7 + $0x30] ss:$8 sps:$4 sm:$0xff]   ;;  %v4070_v31 = vld [vmem:[%s5227_s7 + $0x84] ss:$8 sps:$4 sm:$0xff]  }
 0x7a7   :  { %v2133_v12 = vadd.f32 %v2132_v55, %v2131_v24  ;;  %v2154_v14 = vadd.f32 %v2153_v10, %v2152_v22  ;;  %v2162_v15 = vrot.slane %v2161_v5, 4  ;;  %2559 = vmatpush1.bf16.msra.mxu1 %v4062_v53  ;;  %v4068_v18 = vld [vmem:[%s5227_s7 + $0x80] ss:$8 sps:$4 sm:$0xff]   ;;  %v4073_v23 = vld [vmem:[%s5227_s7 + $0x44] ss:$8 sps:$4 sm:$0xff]   ;;  %v4126_v56 = vld [vmem:[%s5229_s9 + $0x50] sm:$0xff]  }
 0x7a8   :  { %v2142_v25 = vadd.f32 %v2141_v11, %v2140_v29  ;;  %2560 = vmatprep.subr.bf16.mxu1 %v4070_v31  ;;  %v4071_v24 = vld [vmem:[%s5227_s7 + $0x40] ss:$8 sps:$4 sm:$0xff]   ;;  %v4076_v22 = vld [vmem:[%s5227_s7 + $0x94] ss:$8 sps:$4 sm:$0xff]   ;;  %v4074_v43 = vld [vmem:[%s5227_s7 + $0x90] ss:$8 sps:$4 sm:$0xff]  }
 0x7a9   :  { %v2163_v26 = vadd.f32 %v2162_v15, %v2161_v5  ;;  %v2134_v27 = vrot.slane %v2133_v12, 2  ;;  %v2155_v28 = vrot.slane %v2154_v14, 2  ;;  %v4079_v21 = vld [vmem:[%s5227_s7 + $0xf4] ss:$8 sps:$4 sm:$0xff]   ;;  %v4082_v29 = vld [vmem:[%s5227_s7 + $0xa4] ss:$8 sps:$4 sm:$0xff]  }
 0x7aa   :  { %v2143_v30 = vrot.slane %v2142_v25, 2  ;;  %v4127_v53 = vld [vmem:[%s5229_s9 + $0x10] sm:$0xff]   ;;  %v4130_v31 = vld [vmem:[%s5229_s9 + $0x60] sm:$0xff]  }
 0x7ab   :  { %v2164_v37 = vrot.slane %v2163_v26, 2  ;;  %v2135_v38 = vadd.f32 %v2134_v27, %v2133_v12  ;;  %v2156_v40 = vadd.f32 %v2155_v28, %v2154_v14  ;;  %2561 = vmatpush1.bf16.msra.mxu1 %v4068_v18  ;;  %v4077_v28 = vld [vmem:[%s5227_s7 + $0xf0] ss:$8 sps:$4 sm:$0xff]   ;;  %v4131_v18 = vld [vmem:[%s5229_s9 + $0x20] sm:$0xff]  }
 0x7ac   :  { %v2144_v41 = vadd.f32 %v2143_v30, %v2142_v25  ;;  %2562 = vmatprep.subr.bf16.mxu1 %v4076_v22  ;;  %v4134_v22 = vld [vmem:[%s5229_s9 + $0x70] sm:$0xff]  }
 0x7ad   :  { %v2165_v16 = vadd.f32 %v2164_v37, %v2163_v26  ;;  %v2136_v48 = vrot.slane %v2135_v38, 1  ;;  %v2157_v57 = vrot.slane %v2156_v40, 1 }
 0x7ae   :  { %v2145_v32 = vrot.slane %v2144_v41, 1 }
 0x7af   :  { %v2166_v58 = vrot.slane %v2165_v16, 1  ;;  %v2137_v45 = vadd.f32 %v2136_v48, %v2135_v38  ;;  %v2158_v59 = vadd.f32 %v2157_v57, %v2156_v40  ;;  %2563 = vmatpush1.bf16.msra.mxu1 %v4074_v43  ;;  %v4088_v38 = vld [vmem:[%s5227_s7 + $0xb4] ss:$8 sps:$4 sm:$0xff]   ;;  %v4083_v40 = vld [vmem:[%s5227_s7 + $0x100] ss:$8 sps:$4 sm:$0xff]  }
 0x7b0   :  { %v2146_v49 = vadd.f32 %v2145_v32, %v2144_v41  ;;  %2743 = vmatprep.subr.bf16.mxu1 %v4082_v29  ;;  %v4091_v41 = vld [vmem:[%s5227_s7 + $0x114] ss:$8 sps:$4 sm:$0xff]   ;;  %v4094_v48 = vld [vmem:[%s5227_s7 + $0xc4] ss:$8 sps:$4 sm:$0xff]   ;;  %v4089_v57 = vld [vmem:[%s5227_s7 + $0x110] ss:$8 sps:$4 sm:$0xff]  }
 0x7b1   :  { %v2167_v52 = vadd.f32 %v2166_v58, %v2165_v16  ;;  %v2168_v62 = vadd.f32 %v2158_v59, %v2137_v45  ;;  %v4086_v16 = vld [vmem:[%s5227_s7 + $0xb0] ss:$8 sps:$4 sm:$0xff]   ;;  %v4097_v32 = vld [vmem:[%s5227_s7 + $0x124] ss:$8 sps:$4 sm:$0xff]   ;;  %v4092_v58 = vld [vmem:[%s5227_s7 + $0xc0] ss:$8 sps:$4 sm:$0xff]  }
 0x7b2   :  { %v4100_v45 = vld [vmem:[%s5227_s7 + $0xd4] ss:$8 sps:$4 sm:$0xff]   ;;  %v4095_v59 = vld [vmem:[%s5227_s7 + $0x120] ss:$8 sps:$4 sm:$0xff]  }
 0x7b3   :  { %v2169_v1 = vadd.f32 %v2167_v52, %v2146_v49  ;;  %v4103_v49 = vld [vmem:[%s5227_s7 + $0x134] ss:$8 sps:$4 sm:$0xff]   ;;  %v4098_v52 = vld [vmem:[%s5227_s7 + $0xd0] ss:$8 sps:$4 sm:$0xff]  }
 0x7b4   :  { %v4135_v43 = vld [vmem:[%s5229_s9 + $0x30] sm:$0xff]   ;;  %v4137_v29 = vld [vmem:[%s5229_s9 + $0x38] sm:$0xff]  }
 0x7b5   :  { %3421 = vmatprep.mubr.msk.f32.mxu0 %vm131_vm0, %v2169_v1  ;;  %v4101_v1 = vld [vmem:[%s5227_s7 + $0x130] ss:$8 sps:$4 sm:$0xff]  }
 0x7b6   :  { %2238 = vmatmul.mubr.f32.vlgmr.msra.gmra.mrb[14].mxu0 %v2168_v62  ;;  %v4106_v62 = vld [vmem:[%s5227_s7 + $0xe4] ss:$8 sps:$4 sm:$0xff]  }
 0x7b7   :  { %3887 = vmatpush3.bf16.msra.mxu0 %v4863_v44  ;;  %3749 = vmatprep.mubr.msk.f32.mxu0 %vm4175_vm1, %v4176_v51 }
 0x7b8   :  { %3888 = vmatprep.subr.bf16.mxu0 %v4174_v33 }
 0x889   :  { %v2239_v33 = vpop.f32.mrb[14].mxu0 }
 0x88a   :  { %v2243_v46 = vmul.f32 0.005, %v2239_v33  ;;  %v2241_v0 = vpop.f32.mrb[15].mxu0 }
 0x88b   :  { %v4110_v0 = vld [vmem:[%s5227_s7 + $0x150] ss:$8 sps:$4 sm:$0xff]  }
 0x88c   :  { %v2244_v63 = vadd.f32 1e-05, %v2243_v46  ;;  %v4112_v46 = vld [vmem:[%s5227_s7 + $0x154] ss:$8 sps:$4 sm:$0xff]  }
 0x88e   :  { %4148 = vrsqrt.f32 %v2244_v63  ;;  %v4115_v63 = vld [vmem:[%s5227_s7 + $0x164] ss:$8 sps:$4 sm:$0xff]  }
 0x898   :  { %v4149_v2 = vpop.eup %4148 }
 0x899   :  { %3750 = vmatmul.mubr.msk.f32.vlgmr.msra.gmra.mrb[16].mxu0 %vm2035_vm10, %v4149_v2  ;;  %v2247_v3 = vmul.f32 %v4149_v2, %v2246_v13  ;;  %v4113_v13 = vld [vmem:[%s5227_s7 + $0x160] ss:$8 sps:$4 sm:$0xff]   ;;  %v4121_v2 = vld [vmem:[%s5227_s7 + $0x184] ss:$8 sps:$4 sm:$0xff]  }
 0x89a   :  { %3890 = vmatpush3.bf16.msra.mxu0 %v4863_v44  ;;  %3756 = vmatprep.mubr.msk.f32.mxu0 %vm4175_vm1, %v4176_v51  ;;  %v4061_v44 = vld [vmem:[%s5227_s7 + $0x24] ss:$8 sps:$4 sm:$0xff]  }
 0x89b   :  { %2648 = vmatprep.subr.bf16.mxu0 %v4049_v17  ;;  %v4118_v17 = vld [vmem:[%s5227_s7 + $0x174] ss:$8 sps:$4 sm:$0xff]  }
 0x89d   :  { %3757 = vmatmul.mubr.msk.f32.vlgmr.msra.gmra.mrb[18].mxu0 %vm2035_vm10, %v2247_v3  ;;  %v4119_v3 = vld [vmem:[%s5227_s7 + $0x180] ss:$8 sps:$4 sm:$0xff]  }
 0x89e   :  { %2649 = vmatpush1.bf16.msra.mxu0 %v4047_v6  ;;  %2680 = vmatprep.mubr.bf16.mxu0 %v4178_v42 }
 0x89f   :  { %2650 = vmatprep.subr.bf16.mxu0 %v4055_v61  ;;  %v4122_v61 = vld [vmem:[%s5229_s9 + $0x40] sm:$0xff]  }
 0x8a2   :  { %2651 = vmatpush1.bf16.msra.mxu0 %v4053_v7  ;;  %v4123_v7 = vld [vmem:[%s5229_s9] sm:$0xff]  }
 0x8a3   :  { %2652 = vmatprep.subr.bf16.mxu0 %v4061_v44  ;;  %v4124_v44 = vld [vmem:[%s5229_s9 + $0x48] sm:$0xff]  }
 0x8a6   :  { %2653 = vmatpush1.bf16.msra.mxu0 %v4059_v8  ;;  %v4125_v8 = vld [vmem:[%s5229_s9 + $0x8] sm:$0xff]  }
 0x8a7   :  { %2654 = vmatprep.subr.bf16.mxu0 %v4067_v20  ;;  %v4128_v20 = vld [vmem:[%s5229_s9 + $0x58] sm:$0xff]  }
 0x8aa   :  { %2655 = vmatpush1.bf16.msra.mxu0 %v4065_v47  ;;  %v4129_v47 = vld [vmem:[%s5229_s9 + $0x18] sm:$0xff]  }
 0x8ab   :  { %2656 = vmatprep.subr.bf16.mxu0 %v4073_v23  ;;  %v4132_v23 = vld [vmem:[%s5229_s9 + $0x68] sm:$0xff]  }
 0x8ae   :  { %2657 = vmatpush1.bf16.msra.mxu0 %v4071_v24  ;;  %v4133_v24 = vld [vmem:[%s5229_s9 + $0x28] sm:$0xff]  }
 0x8af   :  { %2840 = vmatprep.subr.bf16.mxu0 %v4079_v21  ;;  %v4136_v21 = vld [vmem:[%s5229_s9 + $0x78] sm:$0xff]  }
 0x96c   :  { %v2356_v34 = vpop.f32.mrb[16].mxu0 }
 0x96d   :  { %v2436_v9 = vrot.slane %v2356_v34, %v4527_v39  ;;  %v3751_v55 = vpop.f32.mrb[17].mxu0  ;;  %v4138_v34 = vld [vmem:[%s5231_s11] sm:$0xff]  }
 0x96e   :  { %v4140_v55 = vld [vmem:[%s5231_s11 + $0x10] sm:$0xff]  }
 0x96f   :  { %v2437_v10 = vmul.f32 %v2436_v9, %v4888_v50  ;;  %v2438_v5 = vmul.f32 %v2436_v9, %v4892_v60  ;;  %v4085_v50 = vld [vmem:[%s5227_s7 + $0x104] ss:$8 sps:$4 sm:$0xff]   ;;  %v4080_v60 = vld [vmem:[%s5227_s7 + $0xa0] ss:$8 sps:$4 sm:$0xff]  }
 0x970   :  { %v2429_v11 = vpop.f32.mrb[18].mxu0  ;;  %v4139_v9 = vld [vmem:[%s5231_s11 + $0x8] sm:$0xff]  }
 0x971   :  { %v2442_v12 = vrot.slane %v2429_v11, %v4527_v39  ;;  %v3758_v14 = vpop.f32.mrb[19].mxu0  ;;  %v4143_v11 = vld [vmem:[%s5231_s11 + $0x28] sm:$0xff]  }
 0x973   :  { %v2443_v15 = vadd.f32 %v2442_v12, %v2437_v10  ;;  %v2444_v25 = vadd.f32 %v2442_v12, %v2438_v5  ;;  %v4141_v10 = vld [vmem:[%s5231_s11 + $0x18] sm:$0xff]   ;;  %v4142_v5 = vld [vmem:[%s5231_s11 + $0x20] sm:$0xff]  }
 0x975   :  { %v2445_v26 = vmax.f32 %v2443_v15, 0.0  ;;  %v2446_v27 = vmax.f32 %v2444_v25, 0.0 }
 0x977   :  { %v5019_v30 = vpack.c.bf16 %v2446_v27, %v2445_v26 }
 0x979   :  { %3445 = vmatmul.mubr.msk.bf16.vlgmr.msra.gmra.mrb[20].mxu0 %vm2550_vm11, %v5019_v30  ;;  %v2499_v37 = vrot.slane %v5019_v30, 1  ;;  %v2786_v35 = vrot.slane %v5019_v30, 3  ;;  %v2689_v33 = vrot.slane %v5019_v30, 2  ;;  %v2883_v6 = vrot.slane %v5019_v30, 4 }
 0x97a   :  { %2841 = vmatpush1.bf16.msra.mxu0 %v4077_v28  ;;  %2872 = vmatprep.mubr.bf16.mxu0 %v4178_v42 }
 0x97b   :  { %3434 = vmatmul.mubr.msk.bf16.vlgmr.msra.gmra.mrb[16].mxu1 %vm2550_vm11, %v2499_v37  ;;  %2842 = vmatprep.subr.bf16.mxu0 %v4085_v50 }
 0x97c   :  { %2744 = vmatpush1.bf16.msra.mxu1 %v4080_v60  ;;  %2775 = vmatprep.mubr.bf16.mxu1 %v4178_v42 }
 0x97d   :  { %2745 = vmatprep.subr.bf16.mxu1 %v4088_v38 }
 0x97e   :  { %2843 = vmatpush1.bf16.msra.mxu0 %v4083_v40 }
 0x97f   :  { %2844 = vmatprep.subr.bf16.mxu0 %v4091_v41 }
 0x980   :  { %2746 = vmatpush1.bf16.msra.mxu1 %v4086_v16 }
 0x981   :  { %2747 = vmatprep.subr.bf16.mxu1 %v4094_v48 }
 0x982   :  { %2845 = vmatpush1.bf16.msra.mxu0 %v4089_v57 }
 0x983   :  { %2846 = vmatprep.subr.bf16.mxu0 %v4097_v32 }
 0x984   :  { %2748 = vmatpush1.bf16.msra.mxu1 %v4092_v58 }
 0x985   :  { %2749 = vmatprep.subr.bf16.mxu1 %v4100_v45 }
 0x986   :  { %2847 = vmatpush1.bf16.msra.mxu0 %v4095_v59 }
 0x987   :  { %2848 = vmatprep.subr.bf16.mxu0 %v4103_v49 }
 0x988   :  { %2750 = vmatpush1.bf16.msra.mxu1 %v4098_v52  ;;  %v2980_v52 = vld [vmem:[%s5228_s8] sm:$0x3] }
 0x989   :  { %2751 = vmatprep.subr.bf16.mxu1 %v4106_v62  ;;  %v2988_v62 = vsub.s32 1, %v4524_v36  ;;  %v4144_v36 = vld [vmem:[%s5231_s11 + $0x30] sm:$0xff]  }
 0x98a   :  { %2849 = vmatpush1.bf16.msra.mxu0 %v4101_v1  ;;  %v2985_v1 = vrot.slane %v2980_v52, %v4527_v39  ;;  %v4145_v39 = vld [vmem:[%s5231_s11 + $0x38] sm:$0xff]   ;;  %s3293_s11 = sshll.u32 %s4180_s21, 4  ;;  %s3294_s11 = int_to_ptr.vmem [resolvable:$true] %s3293_s11 }
 0x98b   :  { %3577 = vmatprep.subr.bf16.mxu0 %v4122_v61  ;;  %v3479_v61 = vld [vmem:[%s5230_s10] ss:$0 sm:$0xff]  ;;  %s4150_s10 = scalar_lea.vmem %s3294_s11, 32  ;;  %p4155_p1 = scmp.lt.s32.totalorder %s3294_s11, %s3294_s11 }
 0x98c   :  { %2752 = vmatpush1.bf16.msra.mxu1 %v4104_v4  ;;  %p4151_p0 = scmp.ne.s32.totalorder %s3294_s11, %s4150_s10  ;;  %p4156_p2 = scmp.lt.s32.totalorder %s4150_s10, %s4150_s10 }
 0x98d   :  { %3467 = vmatmul.mubr.msk.bf16.vlgmr.msra.gmra.mrb[24].mxu0 %vm2550_vm11, %v2786_v35  ;;  %2937 = vmatprep.subr.bf16.mxu1 %v4109_v54  ;;  %v2989_v54 = vrot.slane %v2980_v52, %v2988_v62 }
 0x98e   :  { %3578 = vmatpush3.bf16.msra.mxu0 %v4123_v7  ;;  %p4157_p3 = por %p4156_p2, %p4155_p1 }
 0x98f   :  { %3456 = vmatmul.mubr.msk.bf16.vlgmr.msra.gmra.mrb[20].mxu1 %vm2550_vm11, %v2689_v33  ;;  %3579 = vmatprep.subr.bf16.mxu0 %v4124_v44 }
 0x990   :  { %2938 = vmatpush1.bf16.msra.mxu1 %v4107_v19  ;;  %2969 = vmatprep.mubr.bf16.mxu1 %v4178_v42  ;;  %v4116_v42 = vld [vmem:[%s5227_s7 + $0x170] ss:$8 sps:$4 sm:$0xff]   ;;  %p4158_p4 = pnand %p4157_p3, %p4151_p0 }
 0x991   :  { %2939 = vmatprep.subr.bf16.mxu1 %v4112_v46 }
 0x992   :  { %3580 = vmatpush3.bf16.msra.mxu0 %v4125_v8 }
 0x993   :  { %3581 = vmatprep.subr.bf16.mxu0 %v4126_v56 }
 0x994   :  { %2940 = vmatpush1.bf16.msra.mxu1 %v4110_v0 }
 0x995   :  { %2941 = vmatprep.subr.bf16.mxu1 %v4115_v63 }
 0x996   :  { %3582 = vmatpush3.bf16.msra.mxu0 %v4127_v53 }
 0x997   :  { %3583 = vmatprep.subr.bf16.mxu0 %v4128_v20 }
 0x998   :  { %2942 = vmatpush1.bf16.msra.mxu1 %v4113_v13 }
 0x999   :  { %2943 = vmatprep.subr.bf16.mxu1 %v4118_v17 }
 0x99a   :  { %3584 = vmatpush3.bf16.msra.mxu0 %v4129_v47 }
 0x99b   :  { %3585 = vmatprep.subr.bf16.mxu0 %v4130_v31 }
 0x99c   :  { %2944 = vmatpush1.bf16.msra.mxu1 %v4116_v42 }
 0x99d   :  { %2945 = vmatprep.subr.bf16.mxu1 %v4121_v2 }
 0x99e   :  { %3586 = vmatpush3.bf16.msra.mxu0 %v4131_v18 }
 0x99f   :  { %3587 = vmatprep.subr.bf16.mxu0 %v4132_v23 }
 0x9a0   :  { %2946 = vmatpush1.bf16.msra.mxu1 %v4119_v3 }
 0x9a1   :  { %3759 = vmatprep.subr.bf16.mxu1 %v4176_v51 }
 0x9a2   :  { %3588 = vmatpush3.bf16.msra.mxu0 %v4133_v24 }
 0x9a3   :  { %3478 = vmatmul.mubr.msk.bf16.vlgmr.msra.gmra.mrb[24].mxu1 %vm2550_vm11, %v2883_v6  ;;  %3589 = vmatprep.subr.bf16.mxu0 %v4134_v22 }
 0x9a4   :  { %3775 = vmatprep.mubr.msk.bf16.mxu1 %vm4175_vm1, %v4176_v51  ;;  %3760 = vmatpush3.bf16.msra.mxu1 %v4138_v34 }
 0x9a5   :  { %3761 = vmatprep.subr.bf16.mxu1 %v4176_v51 }
 0x9a6   :  { %3590 = vmatpush3.bf16.msra.mxu0 %v4135_v43 }
 0x9a7   :  { %3591 = vmatprep.subr.bf16.mxu0 %v4136_v21 }
 0x9a8   :  { %3762 = vmatpush3.bf16.msra.mxu1 %v4139_v9 }
 0x9a9   :  { %3763 = vmatprep.subr.bf16.mxu1 %v4176_v51 }
 0x9aa   :  { %3592 = vmatpush3.bf16.msra.mxu0 %v4137_v29 }
 0x9ac   :  { %3764 = vmatpush3.bf16.msra.mxu1 %v4140_v55 }
 0x9ad   :  { %3765 = vmatprep.subr.bf16.mxu1 %v4176_v51 }
 0x9b0   :  { %3766 = vmatpush3.bf16.msra.mxu1 %v4141_v10 }
 0x9b1   :  { %3767 = vmatprep.subr.bf16.mxu1 %v4176_v51 }
 0x9b4   :  { %3768 = vmatpush3.bf16.msra.mxu1 %v4142_v5 }
 0x9b5   :  { %3769 = vmatprep.subr.bf16.mxu1 %v4176_v51 }
 0x9b8   :  { %3770 = vmatpush3.bf16.msra.mxu1 %v4143_v11 }
 0x9b9   :  { %3771 = vmatprep.subr.bf16.mxu1 %v4176_v51 }
 0x9bc   :  { %3772 = vmatpush3.bf16.msra.mxu1 %v4144_v36 }
 0x9bd   :  { %3773 = vmatprep.subr.bf16.mxu1 %v4176_v51  ;;  %v3496_v51 = vld [vmem:[%s5232_s12] ss:$0 sm:$0xff] }
 0x9c0   :  { %3774 = vmatpush3.bf16.msra.mxu1 %v4145_v39 }
 0xa4c   :  { %v2682_v12 = vpop.f32.mrb[20].mxu0 }
 0xa4d   :  { %v2684_v14 = vpop.f32.mrb[21].mxu0 }
 0xa4e   :  { %v2588_v15 = vpop.f32.mrb[16].mxu1  ;;  %v2686_v25 = vpop.f32.mrb[22].mxu0 }
 0xa4f   :  { %v2683_v26 = vadd.f32 %v2682_v12, %v2588_v15  ;;  %v2590_v27 = vpop.f32.mrb[17].mxu1  ;;  %v2687_v28 = vpop.f32.mrb[23].mxu0 }
 0xa50   :  { %v2685_v30 = vadd.f32 %v2684_v14, %v2590_v27  ;;  %v2592_v50 = vpop.f32.mrb[18].mxu1 }
 0xa51   :  { %v2593_v60 = vpop.f32.mrb[19].mxu1 }
 0xa60   :  { %v2874_v37 = vpop.f32.mrb[24].mxu0 }
 0xa61   :  { %v2876_v38 = vpop.f32.mrb[25].mxu0 }
 0xa62   :  { %v2777_v40 = vpop.f32.mrb[20].mxu1  ;;  %v2878_v41 = vpop.f32.mrb[26].mxu0 }
 0xa63   :  { %v2784_v16 = vadd.f32 %v2777_v40, %v2683_v26  ;;  %v2779_v48 = vpop.f32.mrb[21].mxu1  ;;  %v2879_v57 = vpop.f32.mrb[27].mxu0 }
 0xa64   :  { %v2785_v32 = vadd.f32 %v2779_v48, %v2685_v30  ;;  %v2781_v58 = vpop.f32.mrb[22].mxu1 }
 0xa65   :  { %v2782_v45 = vpop.f32.mrb[23].mxu1  ;;  %v2881_v59 = vadd.f32 %v2874_v37, %v2784_v16 }
 0xa66   :  { %v2882_v49 = vadd.f32 %v2876_v38, %v2785_v32 }
 0xa76   :  { %v2971_v4 = vpop.f32.mrb[24].mxu1 }
 0xa77   :  { %v2978_v35 = vadd.f32 %v2971_v4, %v2881_v59  ;;  %v2973_v19 = vpop.f32.mrb[25].mxu1 }
 0xa78   :  { %v2979_v33 = vadd.f32 %v2973_v19, %v2882_v49  ;;  %v2975_v46 = vpop.f32.mrb[26].mxu1 }
 0xa79   :  { %v2992_v0 = vadd.f32 %v2985_v1, %v2978_v35  ;;  %v2976_v63 = vpop.f32.mrb[27].mxu1 }
 0xa7a   :  { %v2993_v13 = vadd.f32 %v2989_v54, %v2979_v33 }
 0xa7b   :  { %v2994_v17 = vmax.f32 %v2992_v0, 0.0 }
 0xa7c   :  { %v2995_v42 = vmax.f32 %v2993_v13, 0.0 }
 0xa7d   :  { %v2996_v3 = vpack.c.bf16 %v2994_v17, %v2994_v17 }
 0xa7e   :  { %v2997_v2 = vpack.c.bf16 %v2995_v42, %v2995_v42 }
 0xa80   :  { %3165 = vmatprep.mubr.bf16.mxu0 %v2997_v2 }
 0xa81   :  { %3166 = vmatmul.mubr.bf16.vlgmr.msra.gmra.mrb[28].mxu0 %v2996_v3 }
 0xb54   :  { %v3593_v6 = vpop.f32.mrb[28].mxu0 }
 0xb55   :  { %v3594_v7 = vpop.f32.mrb[29].mxu0 }
 0xb56   :  { %v3595_v44 = vadd.f32 %v3594_v7, %v3593_v6  ;;  %v3596_v8 = vpop.f32.mrb[30].mxu0 }
 0xb57   :  { %v3597_v56 = vpop.f32.mrb[31].mxu0 }
 0xb58   :  { %v3168_v53 = vadd.f32 %v3595_v44, %v3479_v61 }
 0xb5a   :  { %v3173_v20 = vmax.f32 %v3168_v53, 0.0 }
 0xb5c   :  { %v3174_v47 = vpack.c.bf16 %v3173_v20, %v3173_v20 }
 0xb5e   :  { %3776 = vmatmul.mubr.bf16.vlgmr.msra.gmra.mrb[28].mxu1 %v3174_v47 }
 0xc31   :  { %v3280_v31 = vpop.f32.mrb[28].mxu1 }
 0xc32   :  { %v3281_v18 = vadd.f32 %v3496_v51, %v3280_v31  ;;  %v3777_v23 = vpop.f32.mrb[29].mxu1 }
 0xc33   :  { %v3283_v24 = vpop.f32.mrb[30].mxu1 }
 0xc34   :  { %3286 = vst [vmem:[#allocation2] sm:$0x3] %v3281_v18  ;;  %v3778_v22 = vpop.f32.mrb[31].mxu1 }
 0xc35   :  { %4161 = shalt.err (!%p4158_p4)
}
 0xc36   :  { %s4162_s12 = scalar_lea.hbm %s5233_s13, 32 }
 0xc37   :  { %p4163_p5 = scmp.ne.s32.totalorder %s5233_s13, %s4162_s12  ;;  %p4166_p6 = scmp.lt.u32.totalorder %s4162_s12, %s5233_s13 }
 0xc39   :  { %p4168_p7 = pnand %p4166_p6, %p4163_p5 }
 0xc3b   :  { %4171 = shalt.err (!%p4168_p7)
}
 0xc3c   :  { %3296 = dma.vmem_to_hbm [thread:$0]  %s3294_s11, 32, %s5233_s13, [#allocation3]  }
 0xc3d   :  { %4172 = dma.done.wait [#allocation3], 32  }
 0xc3e   :  { %4173 = vsyncadd [#allocation3], 4294967264 }
 0xc3f   :  { %3300 = vsyncpa [#allocation3], 1 }

</bundles_post_ra>
